<compile_context>
chip_gen: v7x
topology: tpu7x:2x2x1
jax: 0.10.0
libtpu: 0.0.40
codegen_flags: <defaults>
</compile_context>

<pallas_src>
import jax
import jax.numpy as jnp
import numpy as np
from jax import lax
from jax.experimental import pallas as pl
from jax.experimental.pallas import tpu as pltpu


# ---------------------------------------------------------------------------
# Geometry (fixed by the module: fc1 expects 20*1*5 features -> input 3x16x32)
# ---------------------------------------------------------------------------
_H, _W = 16, 32            # input spatial size implied by fc1(20*1*5)
_K = 5                     # conv kernel size
_PW2 = 5                   # pooled width after stage 2 (final 20 x 1 x 5)

# Flattened-spatial frame widths (all kept on the 128-lane axis).
_XW = 768                  # padded input row:  lane = h*32 + w (512 valid + zeros)
_Y1W = 512                 # conv1 frame:       lane = oh*32 + ow
_MHW = 448                 # pool1 frame:       lane = 64*i + 2*j   ("in place")
_Y2W = 128                 # conv2 frame:       lane = 64*oh2 + 2*ow2
_M2W = 32                  # pool2 frame:       lane = 4*w


# ---------------------------------------------------------------------------
# Fused kernel: conv1 + relu + pool + conv2 + relu + pool + fc1 + relu
# One grid step == one batch element; everything stays in VMEM / vregs.
# ---------------------------------------------------------------------------
def _fused_cnn_kernel(x_ref, w1_ref, b1_ref, w2_ref, b2_ref, wf_ref, bf_ref, o_ref):
    f32 = jnp.float32
    x = x_ref[0]                                   # (8, 768): channels on sublanes

    # ---- stage 1: conv1 as 25 shifted accumulating dots ((8,8)@(8,512)) ----
    acc1 = None
    for kh in range(_K):
        for kw in range(_K):
            off = kh * _W + kw                     # shift in the h*32+w frame
            t = jnp.dot(w1_ref[kh * _K + kw], x[:, off:off + _Y1W],
                        preferred_element_type=f32)
            acc1 = t if acc1 is None else acc1 + t
    y1 = jnp.maximum(acc1 + b1_ref[...], 0.0)      # (8, 512), valid oh<12, ow<28

    # ---- maxpool 2x2: pooled value lives at lane 64*i + 2*j (no downsample) ----
    mh = None
    for d in (0, 1, _W, _W + 1):
        v = y1[:, d:d + _MHW]
        mh = v if mh is None else jnp.maximum(mh, v)   # (8, 448)

    # ---- stage 2: conv2 as 25 shifted accumulating dots ((32,8)@(8,128)) ----
    acc2 = None
    for kh in range(_K):
        for kw in range(_K):
            off = 2 * _W * kh + 2 * kw             # shift in the 64*i+2*j frame
            t = jnp.dot(w2_ref[kh * _K + kw], mh[:, off:off + _Y2W],
                        preferred_element_type=f32)
            acc2 = t if acc2 is None else acc2 + t
    y2 = jnp.maximum(acc2 + b2_ref[...], 0.0)      # (32, 128), valid oh2<2, ow2<10

    # ---- maxpool 2x2: pooled value lives at lane 4*w ----
    m2 = None
    for d in (0, 2, 2 * _W, 2 * _W + 2):
        v = y2[:, d:d + _M2W]
        m2 = v if m2 is None else jnp.maximum(m2, v)   # (32, 32)

    # ---- fc1 + relu: contract over channels, classes end up lane-dense ----
    m2t = m2.T                                     # (32, 32): lanes = channels
    acc3 = None
    for w in range(_PW2):
        t = jnp.dot(m2t[4 * w:4 * w + 1, :], wf_ref[w],
                    preferred_element_type=f32)    # (1, 32) @ (32, 128)
        acc3 = t if acc3 is None else acc3 + t
    o_ref[0] = jnp.maximum(acc3 + bf_ref[...], 0.0)    # (1, 128) lane-dense store


# ---------------------------------------------------------------------------
# Host-side packing: pad channels / classes to sublane- and lane-friendly sizes.
# Weight layout per tap: wp[kh*5+kw, c_out, c_in]  (matches PyTorch OIHW).
# ---------------------------------------------------------------------------
def _pack_params(w1, b1, w2, b2, wf, bf):
    nc = wf.shape[0]
    w1p = jnp.pad(jnp.transpose(w1, (2, 3, 0, 1)).reshape(25, 6, 3),
                  ((0, 0), (0, 2), (0, 5))).astype(jnp.float32)          # (25, 8, 8)
    b1p = jnp.pad(b1.reshape(6, 1), ((0, 2), (0, 0))).astype(jnp.float32)     # (8, 1)
    w2p = jnp.pad(jnp.transpose(w2, (2, 3, 0, 1)).reshape(25, 20, 6),
                  ((0, 0), (0, 12), (0, 2))).astype(jnp.float32)         # (25, 32, 8)
    b2p = jnp.pad(b2.reshape(20, 1), ((0, 12), (0, 0))).astype(jnp.float32)   # (32, 1)
    # fc weight: out[k] = sum_{c,w} pooled[c, w] * wf[k, c*5 + w]
    wfp = jnp.pad(jnp.transpose(wf.reshape(nc, 20, 5), (2, 1, 0)),
                  ((0, 0), (0, 12), (0, 128 - nc))).astype(jnp.float32)  # (5, 32, 128)
    bfp = jnp.pad(bf.reshape(1, nc), ((0, 0), (0, 128 - nc))).astype(jnp.float32)
    return w1p, b1p, w2p, b2p, wfp, bfp


@jax.jit
def simple_cnn_forward(x, w1, b1, w2, b2, wf, bf):
    n = x.shape[0]
    nc = wf.shape[0]
    # fc1(20*1*5) hard-codes the input spatial size.
    assert x.shape[1:] == (3, _H, _W), "SimpleCNN's fc1 requires a 3x16x32 input"
    assert nc <= 128

    # Input: flatten spatial (free reshape), pad channels->8 and lanes->768
    # so every shifted in-kernel slice stays in bounds.
    xk = jnp.pad(x.reshape(n, 3, _H * _W).astype(jnp.float32),
                 ((0, 0), (0, 5), (0, _XW - _H * _W)))                   # (N, 8, 768)
    w1p, b1p, w2p, b2p, wfp, bfp = _pack_params(w1, b1, w2, b2, wf, bf)

    out = pl.pallas_call(
        _fused_cnn_kernel,
        out_shape=jax.ShapeDtypeStruct((n, 1, 128), jnp.float32),
        grid_spec=pltpu.PrefetchScalarGridSpec(
            num_scalar_prefetch=0,
            grid=(n,),
            in_specs=[
                pl.BlockSpec((1, 8, _XW), lambda i: (i, 0, 0)),     # per-batch input
                pl.BlockSpec((25, 8, 8), lambda i: (0, 0, 0)),      # conv1 weights
                pl.BlockSpec((8, 1), lambda i: (0, 0)),             # conv1 bias
                pl.BlockSpec((25, 32, 8), lambda i: (0, 0, 0)),     # conv2 weights
                pl.BlockSpec((32, 1), lambda i: (0, 0)),            # conv2 bias
                pl.BlockSpec((5, 32, 128), lambda i: (0, 0, 0)),    # fc weights
                pl.BlockSpec((1, 128), lambda i: (0, 0)),           # fc bias
            ],
            out_specs=pl.BlockSpec((1, 1, 128), lambda i: (i, 0, 0)),
        ),
        compiler_params=pltpu.CompilerParams(
            dimension_semantics=("parallel",),      # batch shards across v7x cores
            vmem_limit_bytes=32 * 1024 * 1024,
        ),
    )(xk, w1p, b1p, w2p, b2p, wfp, bfp)

    return out.reshape(n, 128)[:, :nc]


# ---------------------------------------------------------------------------
# Pure-JAX reference (mirrors the PyTorch module), high precision.
# ---------------------------------------------------------------------------
def reference_forward(x, w1, b1, w2, b2, wf, bf):
    dn = ("NCHW", "OIHW", "NCHW")
    hp = lax.Precision.HIGHEST
    y = lax.conv_general_dilated(x, w1, (1, 1), "VALID",
                                 dimension_numbers=dn, precision=hp)
    y = jax.nn.relu(y + b1[None, :, None, None])
    y = lax.reduce_window(y, -jnp.inf, lax.max, (1, 1, 2, 2), (1, 1, 2, 2), "VALID")
    y = lax.conv_general_dilated(y, w2, (1, 1), "VALID",
                                 dimension_numbers=dn, precision=hp)
    y = jax.nn.relu(y + b2[None, :, None, None])
    y = lax.reduce_window(y, -jnp.inf, lax.max, (1, 1, 2, 2), (1, 1, 2, 2), "VALID")
    y = y.reshape(y.shape[0], -1)
    y = jax.nn.relu(jnp.dot(y, wf.T, precision=hp) + bf[None, :])
    return y


if __name__ == "__main__":
    num_classes = 10
    key = jax.random.PRNGKey(0)
    ks = jax.random.split(key, 7)

    # Deterministic parameter init (shapes from SimpleCNN.__init__)
    w1 = jax.random.normal(ks[0], (6, 3, 5, 5), jnp.float32) * 0.1
    b1 = jax.random.normal(ks[1], (6,), jnp.float32) * 0.1
    w2 = jax.random.normal(ks[2], (20, 6, 5, 5), jnp.float32) * 0.1
    b2 = jax.random.normal(ks[3], (20,), jnp.float32) * 0.1
    wf = jax.random.normal(ks[4], (num_classes, 20 * 1 * 5), jnp.float32) * 0.1
    bf = jax.random.normal(ks[5], (num_classes,), jnp.float32) * 0.1

    # Input (N=2, C=3, H=16, W=32): final pooled map is (20, 1, 5) -> 100 features.
    x = jax.random.normal(ks[6], (2, 3, 16, 32), jnp.float32)

    out = jax.block_until_ready(simple_cnn_forward(x, w1, b1, w2, b2, wf, bf))
    ref = reference_forward(x, w1, b1, w2, b2, wf, bf)
    np.testing.assert_allclose(np.asarray(out), np.asarray(ref), rtol=1e-4, atol=1e-4)

    print("KERNEL_OK")
</pallas_src>

<mosaic_0001>
module attributes {stable_mosaic.version = 11 : i64} {
  func.func @_fused_cnn_kernel(%arg0: i32, %arg1: memref<1x8x768xf32, #tpu.memory_space<vmem>>, %arg2: memref<25x8x8xf32, #tpu.memory_space<vmem>>, %arg3: memref<8x1xf32, #tpu.memory_space<vmem>>, %arg4: memref<25x32x8xf32, #tpu.memory_space<vmem>>, %arg5: memref<32x1xf32, #tpu.memory_space<vmem>>, %arg6: memref<5x32x128xf32, #tpu.memory_space<vmem>>, %arg7: memref<1x128xf32, #tpu.memory_space<vmem>>, %arg8: memref<1x1x128xf32, #tpu.memory_space<vmem>>) attributes {dimension_semantics = [#tpu.dimension_semantics<parallel>], iteration_bounds = array<i64: 2>, scalar_prefetch = 0 : i64, scratch_operands = 0 : i64, tpu.core_type = #tpu.core_type<tc>, window_params = [{transform_indices = @transform_0, window_bounds = array<i64: 1, 8, 768>}, {pipeline_mode = #tpu.pipeline_mode<synchronous>, transform_indices = @transform_1, window_bounds = array<i64: 25, 8, 8>}, {pipeline_mode = #tpu.pipeline_mode<synchronous>, transform_indices = @transform_2, window_bounds = array<i64: 8, 1>}, {pipeline_mode = #tpu.pipeline_mode<synchronous>, transform_indices = @transform_3, window_bounds = array<i64: 25, 32, 8>}, {pipeline_mode = #tpu.pipeline_mode<synchronous>, transform_indices = @transform_4, window_bounds = array<i64: 32, 1>}, {pipeline_mode = #tpu.pipeline_mode<synchronous>, transform_indices = @transform_5, window_bounds = array<i64: 5, 32, 128>}, {pipeline_mode = #tpu.pipeline_mode<synchronous>, transform_indices = @transform_6, window_bounds = array<i64: 1, 128>}, {transform_indices = @transform_7, window_bounds = array<i64: 1, 1, 128>}]} {
    %c0 = arith.constant 0 : index
    %c0_0 = arith.constant 0 : index
    %c0_1 = arith.constant 0 : index
    %0 = vector.load %arg1[%c0, %c0_0, %c0_1] : memref<1x8x768xf32, #tpu.memory_space<vmem>>, vector<1x8x768xf32>
    %1 = vector.shape_cast %0 : vector<1x8x768xf32> to vector<8x768xf32>
    %c0_2 = arith.constant 0 : index
    %c0_3 = arith.constant 0 : index
    %c0_4 = arith.constant 0 : index
    %2 = vector.load %arg2[%c0_2, %c0_3, %c0_4] : memref<25x8x8xf32, #tpu.memory_space<vmem>>, vector<1x8x8xf32>
    %3 = vector.shape_cast %2 : vector<1x8x8xf32> to vector<8x8xf32>
    %4 = vector.extract_strided_slice %1 {offsets = [0, 0], sizes = [8, 512], strides = [1, 1]} : vector<8x768xf32> to vector<8x512xf32>
    %cst = arith.constant dense<0.000000e+00> : vector<8x512xf32>
    %5 = tpu.matmul %3, %4, %cst {dimension_numbers = #tpu.dot_dimension_numbers<[1], [0], [0], [1], [0, 0, 1, 1], [], []>} : vector<8x8xf32>, vector<8x512xf32>, vector<8x512xf32> -> vector<8x512xf32>
    %c1 = arith.constant 1 : index
    %c0_5 = arith.constant 0 : index
    %c0_6 = arith.constant 0 : index
    %6 = vector.load %arg2[%c1, %c0_5, %c0_6] : memref<25x8x8xf32, #tpu.memory_space<vmem>>, vector<1x8x8xf32>
    %7 = vector.shape_cast %6 : vector<1x8x8xf32> to vector<8x8xf32>
    %8 = vector.extract_strided_slice %1 {offsets = [0, 1], sizes = [8, 512], strides = [1, 1]} : vector<8x768xf32> to vector<8x512xf32>
    %cst_7 = arith.constant dense<0.000000e+00> : vector<8x512xf32>
    %9 = tpu.matmul %7, %8, %cst_7 {dimension_numbers = #tpu.dot_dimension_numbers<[1], [0], [0], [1], [0, 0, 1, 1], [], []>} : vector<8x8xf32>, vector<8x512xf32>, vector<8x512xf32> -> vector<8x512xf32>
    %10 = arith.addf %5, %9 : vector<8x512xf32>
    %c2 = arith.constant 2 : index
    %c0_8 = arith.constant 0 : index
    %c0_9 = arith.constant 0 : index
    %11 = vector.load %arg2[%c2, %c0_8, %c0_9] : memref<25x8x8xf32, #tpu.memory_space<vmem>>, vector<1x8x8xf32>
    %12 = vector.shape_cast %11 : vector<1x8x8xf32> to vector<8x8xf32>
    %13 = vector.extract_strided_slice %1 {offsets = [0, 2], sizes = [8, 512], strides = [1, 1]} : vector<8x768xf32> to vector<8x512xf32>
    %cst_10 = arith.constant dense<0.000000e+00> : vector<8x512xf32>
    %14 = tpu.matmul %12, %13, %cst_10 {dimension_numbers = #tpu.dot_dimension_numbers<[1], [0], [0], [1], [0, 0, 1, 1], [], []>} : vector<8x8xf32>, vector<8x512xf32>, vector<8x512xf32> -> vector<8x512xf32>
    %15 = arith.addf %10, %14 : vector<8x512xf32>
    %c3 = arith.constant 3 : index
    %c0_11 = arith.constant 0 : index
    %c0_12 = arith.constant 0 : index
    %16 = vector.load %arg2[%c3, %c0_11, %c0_12] : memref<25x8x8xf32, #tpu.memory_space<vmem>>, vector<1x8x8xf32>
    %17 = vector.shape_cast %16 : vector<1x8x8xf32> to vector<8x8xf32>
    %18 = vector.extract_strided_slice %1 {offsets = [0, 3], sizes = [8, 512], strides = [1, 1]} : vector<8x768xf32> to vector<8x512xf32>
    %cst_13 = arith.constant dense<0.000000e+00> : vector<8x512xf32>
    %19 = tpu.matmul %17, %18, %cst_13 {dimension_numbers = #tpu.dot_dimension_numbers<[1], [0], [0], [1], [0, 0, 1, 1], [], []>} : vector<8x8xf32>, vector<8x512xf32>, vector<8x512xf32> -> vector<8x512xf32>
    %20 = arith.addf %15, %19 : vector<8x512xf32>
    %c4 = arith.constant 4 : index
    %c0_14 = arith.constant 0 : index
    %c0_15 = arith.constant 0 : index
    %21 = vector.load %arg2[%c4, %c0_14, %c0_15] : memref<25x8x8xf32, #tpu.memory_space<vmem>>, vector<1x8x8xf32>
    %22 = vector.shape_cast %21 : vector<1x8x8xf32> to vector<8x8xf32>
    %23 = vector.extract_strided_slice %1 {offsets = [0, 4], sizes = [8, 512], strides = [1, 1]} : vector<8x768xf32> to vector<8x512xf32>
    %cst_16 = arith.constant dense<0.000000e+00> : vector<8x512xf32>
    %24 = tpu.matmul %22, %23, %cst_16 {dimension_numbers = #tpu.dot_dimension_numbers<[1], [0], [0], [1], [0, 0, 1, 1], [], []>} : vector<8x8xf32>, vector<8x512xf32>, vector<8x512xf32> -> vector<8x512xf32>
    %25 = arith.addf %20, %24 : vector<8x512xf32>
    %c5 = arith.constant 5 : index
    %c0_17 = arith.constant 0 : index
    %c0_18 = arith.constant 0 : index
    %26 = vector.load %arg2[%c5, %c0_17, %c0_18] : memref<25x8x8xf32, #tpu.memory_space<vmem>>, vector<1x8x8xf32>
    %27 = vector.shape_cast %26 : vector<1x8x8xf32> to vector<8x8xf32>
    %28 = vector.extract_strided_slice %1 {offsets = [0, 32], sizes = [8, 512], strides = [1, 1]} : vector<8x768xf32> to vector<8x512xf32>
    %cst_19 = arith.constant dense<0.000000e+00> : vector<8x512xf32>
    %29 = tpu.matmul %27, %28, %cst_19 {dimension_numbers = #tpu.dot_dimension_numbers<[1], [0], [0], [1], [0, 0, 1, 1], [], []>} : vector<8x8xf32>, vector<8x512xf32>, vector<8x512xf32> -> vector<8x512xf32>
    %30 = arith.addf %25, %29 : vector<8x512xf32>
    %c6 = arith.constant 6 : index
    %c0_20 = arith.constant 0 : index
    %c0_21 = arith.constant 0 : index
    %31 = vector.load %arg2[%c6, %c0_20, %c0_21] : memref<25x8x8xf32, #tpu.memory_space<vmem>>, vector<1x8x8xf32>
    %32 = vector.shape_cast %31 : vector<1x8x8xf32> to vector<8x8xf32>
    %33 = vector.extract_strided_slice %1 {offsets = [0, 33], sizes = [8, 512], strides = [1, 1]} : vector<8x768xf32> to vector<8x512xf32>
    %cst_22 = arith.constant dense<0.000000e+00> : vector<8x512xf32>
    %34 = tpu.matmul %32, %33, %cst_22 {dimension_numbers = #tpu.dot_dimension_numbers<[1], [0], [0], [1], [0, 0, 1, 1], [], []>} : vector<8x8xf32>, vector<8x512xf32>, vector<8x512xf32> -> vector<8x512xf32>
    %35 = arith.addf %30, %34 : vector<8x512xf32>
    %c7 = arith.constant 7 : index
    %c0_23 = arith.constant 0 : index
    %c0_24 = arith.constant 0 : index
    %36 = vector.load %arg2[%c7, %c0_23, %c0_24] : memref<25x8x8xf32, #tpu.memory_space<vmem>>, vector<1x8x8xf32>
    %37 = vector.shape_cast %36 : vector<1x8x8xf32> to vector<8x8xf32>
    %38 = vector.extract_strided_slice %1 {offsets = [0, 34], sizes = [8, 512], strides = [1, 1]} : vector<8x768xf32> to vector<8x512xf32>
    %cst_25 = arith.constant dense<0.000000e+00> : vector<8x512xf32>
    %39 = tpu.matmul %37, %38, %cst_25 {dimension_numbers = #tpu.dot_dimension_numbers<[1], [0], [0], [1], [0, 0, 1, 1], [], []>} : vector<8x8xf32>, vector<8x512xf32>, vector<8x512xf32> -> vector<8x512xf32>
    %40 = arith.addf %35, %39 : vector<8x512xf32>
    %c8 = arith.constant 8 : index
    %c0_26 = arith.constant 0 : index
    %c0_27 = arith.constant 0 : index
    %41 = vector.load %arg2[%c8, %c0_26, %c0_27] : memref<25x8x8xf32, #tpu.memory_space<vmem>>, vector<1x8x8xf32>
    %42 = vector.shape_cast %41 : vector<1x8x8xf32> to vector<8x8xf32>
    %43 = vector.extract_strided_slice %1 {offsets = [0, 35], sizes = [8, 512], strides = [1, 1]} : vector<8x768xf32> to vector<8x512xf32>
    %cst_28 = arith.constant dense<0.000000e+00> : vector<8x512xf32>
    %44 = tpu.matmul %42, %43, %cst_28 {dimension_numbers = #tpu.dot_dimension_numbers<[1], [0], [0], [1], [0, 0, 1, 1], [], []>} : vector<8x8xf32>, vector<8x512xf32>, vector<8x512xf32> -> vector<8x512xf32>
    %45 = arith.addf %40, %44 : vector<8x512xf32>
    %c9 = arith.constant 9 : index
    %c0_29 = arith.constant 0 : index
    %c0_30 = arith.constant 0 : index
    %46 = vector.load %arg2[%c9, %c0_29, %c0_30] : memref<25x8x8xf32, #tpu.memory_space<vmem>>, vector<1x8x8xf32>
    %47 = vector.shape_cast %46 : vector<1x8x8xf32> to vector<8x8xf32>
    %48 = vector.extract_strided_slice %1 {offsets = [0, 36], sizes = [8, 512], strides = [1, 1]} : vector<8x768xf32> to vector<8x512xf32>
    %cst_31 = arith.constant dense<0.000000e+00> : vector<8x512xf32>
    %49 = tpu.matmul %47, %48, %cst_31 {dimension_numbers = #tpu.dot_dimension_numbers<[1], [0], [0], [1], [0, 0, 1, 1], [], []>} : vector<8x8xf32>, vector<8x512xf32>, vector<8x512xf32> -> vector<8x512xf32>
    %50 = arith.addf %45, %49 : vector<8x512xf32>
    %c10 = arith.constant 10 : index
    %c0_32 = arith.constant 0 : index
    %c0_33 = arith.constant 0 : index
    %51 = vector.load %arg2[%c10, %c0_32, %c0_33] : memref<25x8x8xf32, #tpu.memory_space<vmem>>, vector<1x8x8xf32>
    %52 = vector.shape_cast %51 : vector<1x8x8xf32> to vector<8x8xf32>
    %53 = vector.extract_strided_slice %1 {offsets = [0, 64], sizes = [8, 512], strides = [1, 1]} : vector<8x768xf32> to vector<8x512xf32>
    %cst_34 = arith.constant dense<0.000000e+00> : vector<8x512xf32>
    %54 = tpu.matmul %52, %53, %cst_34 {dimension_numbers = #tpu.dot_dimension_numbers<[1], [0], [0], [1], [0, 0, 1, 1], [], []>} : vector<8x8xf32>, vector<8x512xf32>, vector<8x512xf32> -> vector<8x512xf32>
    %55 = arith.addf %50, %54 : vector<8x512xf32>
    %c11 = arith.constant 11 : index
    %c0_35 = arith.constant 0 : index
    %c0_36 = arith.constant 0 : index
    %56 = vector.load %arg2[%c11, %c0_35, %c0_36] : memref<25x8x8xf32, #tpu.memory_space<vmem>>, vector<1x8x8xf32>
    %57 = vector.shape_cast %56 : vector<1x8x8xf32> to vector<8x8xf32>
    %58 = vector.extract_strided_slice %1 {offsets = [0, 65], sizes = [8, 512], strides = [1, 1]} : vector<8x768xf32> to vector<8x512xf32>
    %cst_37 = arith.constant dense<0.000000e+00> : vector<8x512xf32>
    %59 = tpu.matmul %57, %58, %cst_37 {dimension_numbers = #tpu.dot_dimension_numbers<[1], [0], [0], [1], [0, 0, 1, 1], [], []>} : vector<8x8xf32>, vector<8x512xf32>, vector<8x512xf32> -> vector<8x512xf32>
    %60 = arith.addf %55, %59 : vector<8x512xf32>
    %c12 = arith.constant 12 : index
    %c0_38 = arith.constant 0 : index
    %c0_39 = arith.constant 0 : index
    %61 = vector.load %arg2[%c12, %c0_38, %c0_39] : memref<25x8x8xf32, #tpu.memory_space<vmem>>, vector<1x8x8xf32>
    %62 = vector.shape_cast %61 : vector<1x8x8xf32> to vector<8x8xf32>
    %63 = vector.extract_strided_slice %1 {offsets = [0, 66], sizes = [8, 512], strides = [1, 1]} : vector<8x768xf32> to vector<8x512xf32>
    %cst_40 = arith.constant dense<0.000000e+00> : vector<8x512xf32>
    %64 = tpu.matmul %62, %63, %cst_40 {dimension_numbers = #tpu.dot_dimension_numbers<[1], [0], [0], [1], [0, 0, 1, 1], [], []>} : vector<8x8xf32>, vector<8x512xf32>, vector<8x512xf32> -> vector<8x512xf32>
    %65 = arith.addf %60, %64 : vector<8x512xf32>
    %c13 = arith.constant 13 : index
    %c0_41 = arith.constant 0 : index
    %c0_42 = arith.constant 0 : index
    %66 = vector.load %arg2[%c13, %c0_41, %c0_42] : memref<25x8x8xf32, #tpu.memory_space<vmem>>, vector<1x8x8xf32>
    %67 = vector.shape_cast %66 : vector<1x8x8xf32> to vector<8x8xf32>
    %68 = vector.extract_strided_slice %1 {offsets = [0, 67], sizes = [8, 512], strides = [1, 1]} : vector<8x768xf32> to vector<8x512xf32>
    %cst_43 = arith.constant dense<0.000000e+00> : vector<8x512xf32>
    %69 = tpu.matmul %67, %68, %cst_43 {dimension_numbers = #tpu.dot_dimension_numbers<[1], [0], [0], [1], [0, 0, 1, 1], [], []>} : vector<8x8xf32>, vector<8x512xf32>, vector<8x512xf32> -> vector<8x512xf32>
    %70 = arith.addf %65, %69 : vector<8x512xf32>
    %c14 = arith.constant 14 : index
    %c0_44 = arith.constant 0 : index
    %c0_45 = arith.constant 0 : index
    %71 = vector.load %arg2[%c14, %c0_44, %c0_45] : memref<25x8x8xf32, #tpu.memory_space<vmem>>, vector<1x8x8xf32>
    %72 = vector.shape_cast %71 : vector<1x8x8xf32> to vector<8x8xf32>
    %73 = vector.extract_strided_slice %1 {offsets = [0, 68], sizes = [8, 512], strides = [1, 1]} : vector<8x768xf32> to vector<8x512xf32>
    %cst_46 = arith.constant dense<0.000000e+00> : vector<8x512xf32>
    %74 = tpu.matmul %72, %73, %cst_46 {dimension_numbers = #tpu.dot_dimension_numbers<[1], [0], [0], [1], [0, 0, 1, 1], [], []>} : vector<8x8xf32>, vector<8x512xf32>, vector<8x512xf32> -> vector<8x512xf32>
    %75 = arith.addf %70, %74 : vector<8x512xf32>
    %c15 = arith.constant 15 : index
    %c0_47 = arith.constant 0 : index
    %c0_48 = arith.constant 0 : index
    %76 = vector.load %arg2[%c15, %c0_47, %c0_48] : memref<25x8x8xf32, #tpu.memory_space<vmem>>, vector<1x8x8xf32>
    %77 = vector.shape_cast %76 : vector<1x8x8xf32> to vector<8x8xf32>
    %78 = vector.extract_strided_slice %1 {offsets = [0, 96], sizes = [8, 512], strides = [1, 1]} : vector<8x768xf32> to vector<8x512xf32>
    %cst_49 = arith.constant dense<0.000000e+00> : vector<8x512xf32>
    %79 = tpu.matmul %77, %78, %cst_49 {dimension_numbers = #tpu.dot_dimension_numbers<[1], [0], [0], [1], [0, 0, 1, 1], [], []>} : vector<8x8xf32>, vector<8x512xf32>, vector<8x512xf32> -> vector<8x512xf32>
    %80 = arith.addf %75, %79 : vector<8x512xf32>
    %c16 = arith.constant 16 : index
    %c0_50 = arith.constant 0 : index
    %c0_51 = arith.constant 0 : index
    %81 = vector.load %arg2[%c16, %c0_50, %c0_51] : memref<25x8x8xf32, #tpu.memory_space<vmem>>, vector<1x8x8xf32>
    %82 = vector.shape_cast %81 : vector<1x8x8xf32> to vector<8x8xf32>
    %83 = vector.extract_strided_slice %1 {offsets = [0, 97], sizes = [8, 512], strides = [1, 1]} : vector<8x768xf32> to vector<8x512xf32>
    %cst_52 = arith.constant dense<0.000000e+00> : vector<8x512xf32>
    %84 = tpu.matmul %82, %83, %cst_52 {dimension_numbers = #tpu.dot_dimension_numbers<[1], [0], [0], [1], [0, 0, 1, 1], [], []>} : vector<8x8xf32>, vector<8x512xf32>, vector<8x512xf32> -> vector<8x512xf32>
    %85 = arith.addf %80, %84 : vector<8x512xf32>
    %c17 = arith.constant 17 : index
    %c0_53 = arith.constant 0 : index
    %c0_54 = arith.constant 0 : index
    %86 = vector.load %arg2[%c17, %c0_53, %c0_54] : memref<25x8x8xf32, #tpu.memory_space<vmem>>, vector<1x8x8xf32>
    %87 = vector.shape_cast %86 : vector<1x8x8xf32> to vector<8x8xf32>
    %88 = vector.extract_strided_slice %1 {offsets = [0, 98], sizes = [8, 512], strides = [1, 1]} : vector<8x768xf32> to vector<8x512xf32>
    %cst_55 = arith.constant dense<0.000000e+00> : vector<8x512xf32>
    %89 = tpu.matmul %87, %88, %cst_55 {dimension_numbers = #tpu.dot_dimension_numbers<[1], [0], [0], [1], [0, 0, 1, 1], [], []>} : vector<8x8xf32>, vector<8x512xf32>, vector<8x512xf32> -> vector<8x512xf32>
    %90 = arith.addf %85, %89 : vector<8x512xf32>
    %c18 = arith.constant 18 : index
    %c0_56 = arith.constant 0 : index
    %c0_57 = arith.constant 0 : index
    %91 = vector.load %arg2[%c18, %c0_56, %c0_57] : memref<25x8x8xf32, #tpu.memory_space<vmem>>, vector<1x8x8xf32>
    %92 = vector.shape_cast %91 : vector<1x8x8xf32> to vector<8x8xf32>
    %93 = vector.extract_strided_slice %1 {offsets = [0, 99], sizes = [8, 512], strides = [1, 1]} : vector<8x768xf32> to vector<8x512xf32>
    %cst_58 = arith.constant dense<0.000000e+00> : vector<8x512xf32>
    %94 = tpu.matmul %92, %93, %cst_58 {dimension_numbers = #tpu.dot_dimension_numbers<[1], [0], [0], [1], [0, 0, 1, 1], [], []>} : vector<8x8xf32>, vector<8x512xf32>, vector<8x512xf32> -> vector<8x512xf32>
    %95 = arith.addf %90, %94 : vector<8x512xf32>
    %c19 = arith.constant 19 : index
    %c0_59 = arith.constant 0 : index
    %c0_60 = arith.constant 0 : index
    %96 = vector.load %arg2[%c19, %c0_59, %c0_60] : memref<25x8x8xf32, #tpu.memory_space<vmem>>, vector<1x8x8xf32>
    %97 = vector.shape_cast %96 : vector<1x8x8xf32> to vector<8x8xf32>
    %98 = vector.extract_strided_slice %1 {offsets = [0, 100], sizes = [8, 512], strides = [1, 1]} : vector<8x768xf32> to vector<8x512xf32>
    %cst_61 = arith.constant dense<0.000000e+00> : vector<8x512xf32>
    %99 = tpu.matmul %97, %98, %cst_61 {dimension_numbers = #tpu.dot_dimension_numbers<[1], [0], [0], [1], [0, 0, 1, 1], [], []>} : vector<8x8xf32>, vector<8x512xf32>, vector<8x512xf32> -> vector<8x512xf32>
    %100 = arith.addf %95, %99 : vector<8x512xf32>
    %c20 = arith.constant 20 : index
    %c0_62 = arith.constant 0 : index
    %c0_63 = arith.constant 0 : index
    %101 = vector.load %arg2[%c20, %c0_62, %c0_63] : memref<25x8x8xf32, #tpu.memory_space<vmem>>, vector<1x8x8xf32>
    %102 = vector.shape_cast %101 : vector<1x8x8xf32> to vector<8x8xf32>
    %103 = vector.extract_strided_slice %1 {offsets = [0, 128], sizes = [8, 512], strides = [1, 1]} : vector<8x768xf32> to vector<8x512xf32>
    %cst_64 = arith.constant dense<0.000000e+00> : vector<8x512xf32>
    %104 = tpu.matmul %102, %103, %cst_64 {dimension_numbers = #tpu.dot_dimension_numbers<[1], [0], [0], [1], [0, 0, 1, 1], [], []>} : vector<8x8xf32>, vector<8x512xf32>, vector<8x512xf32> -> vector<8x512xf32>
    %105 = arith.addf %100, %104 : vector<8x512xf32>
    %c21 = arith.constant 21 : index
    %c0_65 = arith.constant 0 : index
    %c0_66 = arith.constant 0 : index
    %106 = vector.load %arg2[%c21, %c0_65, %c0_66] : memref<25x8x8xf32, #tpu.memory_space<vmem>>, vector<1x8x8xf32>
    %107 = vector.shape_cast %106 : vector<1x8x8xf32> to vector<8x8xf32>
    %108 = vector.extract_strided_slice %1 {offsets = [0, 129], sizes = [8, 512], strides = [1, 1]} : vector<8x768xf32> to vector<8x512xf32>
    %cst_67 = arith.constant dense<0.000000e+00> : vector<8x512xf32>
    %109 = tpu.matmul %107, %108, %cst_67 {dimension_numbers = #tpu.dot_dimension_numbers<[1], [0], [0], [1], [0, 0, 1, 1], [], []>} : vector<8x8xf32>, vector<8x512xf32>, vector<8x512xf32> -> vector<8x512xf32>
    %110 = arith.addf %105, %109 : vector<8x512xf32>
    %c22 = arith.constant 22 : index
    %c0_68 = arith.constant 0 : index
    %c0_69 = arith.constant 0 : index
    %111 = vector.load %arg2[%c22, %c0_68, %c0_69] : memref<25x8x8xf32, #tpu.memory_space<vmem>>, vector<1x8x8xf32>
    %112 = vector.shape_cast %111 : vector<1x8x8xf32> to vector<8x8xf32>
    %113 = vector.extract_strided_slice %1 {offsets = [0, 130], sizes = [8, 512], strides = [1, 1]} : vector<8x768xf32> to vector<8x512xf32>
    %cst_70 = arith.constant dense<0.000000e+00> : vector<8x512xf32>
    %114 = tpu.matmul %112, %113, %cst_70 {dimension_numbers = #tpu.dot_dimension_numbers<[1], [0], [0], [1], [0, 0, 1, 1], [], []>} : vector<8x8xf32>, vector<8x512xf32>, vector<8x512xf32> -> vector<8x512xf32>
    %115 = arith.addf %110, %114 : vector<8x512xf32>
    %c23 = arith.constant 23 : index
    %c0_71 = arith.constant 0 : index
    %c0_72 = arith.constant 0 : index
    %116 = vector.load %arg2[%c23, %c0_71, %c0_72] : memref<25x8x8xf32, #tpu.memory_space<vmem>>, vector<1x8x8xf32>
    %117 = vector.shape_cast %116 : vector<1x8x8xf32> to vector<8x8xf32>
    %118 = vector.extract_strided_slice %1 {offsets = [0, 131], sizes = [8, 512], strides = [1, 1]} : vector<8x768xf32> to vector<8x512xf32>
    %cst_73 = arith.constant dense<0.000000e+00> : vector<8x512xf32>
    %119 = tpu.matmul %117, %118, %cst_73 {dimension_numbers = #tpu.dot_dimension_numbers<[1], [0], [0], [1], [0, 0, 1, 1], [], []>} : vector<8x8xf32>, vector<8x512xf32>, vector<8x512xf32> -> vector<8x512xf32>
    %120 = arith.addf %115, %119 : vector<8x512xf32>
    %c24 = arith.constant 24 : index
    %c0_74 = arith.constant 0 : index
    %c0_75 = arith.constant 0 : index
    %121 = vector.load %arg2[%c24, %c0_74, %c0_75] : memref<25x8x8xf32, #tpu.memory_space<vmem>>, vector<1x8x8xf32>
    %122 = vector.shape_cast %121 : vector<1x8x8xf32> to vector<8x8xf32>
    %123 = vector.extract_strided_slice %1 {offsets = [0, 132], sizes = [8, 512], strides = [1, 1]} : vector<8x768xf32> to vector<8x512xf32>
    %cst_76 = arith.constant dense<0.000000e+00> : vector<8x512xf32>
    %124 = tpu.matmul %122, %123, %cst_76 {dimension_numbers = #tpu.dot_dimension_numbers<[1], [0], [0], [1], [0, 0, 1, 1], [], []>} : vector<8x8xf32>, vector<8x512xf32>, vector<8x512xf32> -> vector<8x512xf32>
    %125 = arith.addf %120, %124 : vector<8x512xf32>
    %c0_77 = arith.constant 0 : index
    %c0_78 = arith.constant 0 : index
    %126 = vector.load %arg3[%c0_77, %c0_78] : memref<8x1xf32, #tpu.memory_space<vmem>>, vector<8x1xf32>
    %127 = vector.broadcast %126 : vector<8x1xf32> to vector<8x512xf32>
    %128 = arith.addf %125, %127 : vector<8x512xf32>
    %cst_79 = arith.constant 0.000000e+00 : f32
    %129 = vector.broadcast %cst_79 : f32 to vector<8x512xf32>
    %130 = arith.maximumf %128, %129 : vector<8x512xf32>
    %131 = vector.extract_strided_slice %130 {offsets = [0, 0], sizes = [8, 448], strides = [1, 1]} : vector<8x512xf32> to vector<8x448xf32>
    %132 = vector.extract_strided_slice %130 {offsets = [0, 1], sizes = [8, 448], strides = [1, 1]} : vector<8x512xf32> to vector<8x448xf32>
    %133 = arith.maximumf %131, %132 : vector<8x448xf32>
    %134 = vector.extract_strided_slice %130 {offsets = [0, 32], sizes = [8, 448], strides = [1, 1]} : vector<8x512xf32> to vector<8x448xf32>
    %135 = arith.maximumf %133, %134 : vector<8x448xf32>
    %136 = vector.extract_strided_slice %130 {offsets = [0, 33], sizes = [8, 448], strides = [1, 1]} : vector<8x512xf32> to vector<8x448xf32>
    %137 = arith.maximumf %135, %136 : vector<8x448xf32>
    %c0_80 = arith.constant 0 : index
    %c0_81 = arith.constant 0 : index
    %c0_82 = arith.constant 0 : index
    %138 = vector.load %arg4[%c0_80, %c0_81, %c0_82] : memref<25x32x8xf32, #tpu.memory_space<vmem>>, vector<1x32x8xf32>
    %139 = vector.shape_cast %138 : vector<1x32x8xf32> to vector<32x8xf32>
    %140 = vector.extract_strided_slice %137 {offsets = [0, 0], sizes = [8, 128], strides = [1, 1]} : vector<8x448xf32> to vector<8x128xf32>
    %cst_83 = arith.constant dense<0.000000e+00> : vector<32x128xf32>
    %141 = tpu.matmul %139, %140, %cst_83 {dimension_numbers = #tpu.dot_dimension_numbers<[1], [0], [0], [1], [0, 0, 1, 1], [], []>} : vector<32x8xf32>, vector<8x128xf32>, vector<32x128xf32> -> vector<32x128xf32>
    %c1_84 = arith.constant 1 : index
    %c0_85 = arith.constant 0 : index
    %c0_86 = arith.constant 0 : index
    %142 = vector.load %arg4[%c1_84, %c0_85, %c0_86] : memref<25x32x8xf32, #tpu.memory_space<vmem>>, vector<1x32x8xf32>
    %143 = vector.shape_cast %142 : vector<1x32x8xf32> to vector<32x8xf32>
    %144 = vector.extract_strided_slice %137 {offsets = [0, 2], sizes = [8, 128], strides = [1, 1]} : vector<8x448xf32> to vector<8x128xf32>
    %cst_87 = arith.constant dense<0.000000e+00> : vector<32x128xf32>
    %145 = tpu.matmul %143, %144, %cst_87 {dimension_numbers = #tpu.dot_dimension_numbers<[1], [0], [0], [1], [0, 0, 1, 1], [], []>} : vector<32x8xf32>, vector<8x128xf32>, vector<32x128xf32> -> vector<32x128xf32>
    %146 = arith.addf %141, %145 : vector<32x128xf32>
    %c2_88 = arith.constant 2 : index
    %c0_89 = arith.constant 0 : index
    %c0_90 = arith.constant 0 : index
    %147 = vector.load %arg4[%c2_88, %c0_89, %c0_90] : memref<25x32x8xf32, #tpu.memory_space<vmem>>, vector<1x32x8xf32>
    %148 = vector.shape_cast %147 : vector<1x32x8xf32> to vector<32x8xf32>
    %149 = vector.extract_strided_slice %137 {offsets = [0, 4], sizes = [8, 128], strides = [1, 1]} : vector<8x448xf32> to vector<8x128xf32>
    %cst_91 = arith.constant dense<0.000000e+00> : vector<32x128xf32>
    %150 = tpu.matmul %148, %149, %cst_91 {dimension_numbers = #tpu.dot_dimension_numbers<[1], [0], [0], [1], [0, 0, 1, 1], [], []>} : vector<32x8xf32>, vector<8x128xf32>, vector<32x128xf32> -> vector<32x128xf32>
    %151 = arith.addf %146, %150 : vector<32x128xf32>
    %c3_92 = arith.constant 3 : index
    %c0_93 = arith.constant 0 : index
    %c0_94 = arith.constant 0 : index
    %152 = vector.load %arg4[%c3_92, %c0_93, %c0_94] : memref<25x32x8xf32, #tpu.memory_space<vmem>>, vector<1x32x8xf32>
    %153 = vector.shape_cast %152 : vector<1x32x8xf32> to vector<32x8xf32>
    %154 = vector.extract_strided_slice %137 {offsets = [0, 6], sizes = [8, 128], strides = [1, 1]} : vector<8x448xf32> to vector<8x128xf32>
    %cst_95 = arith.constant dense<0.000000e+00> : vector<32x128xf32>
    %155 = tpu.matmul %153, %154, %cst_95 {dimension_numbers = #tpu.dot_dimension_numbers<[1], [0], [0], [1], [0, 0, 1, 1], [], []>} : vector<32x8xf32>, vector<8x128xf32>, vector<32x128xf32> -> vector<32x128xf32>
    %156 = arith.addf %151, %155 : vector<32x128xf32>
    %c4_96 = arith.constant 4 : index
    %c0_97 = arith.constant 0 : index
    %c0_98 = arith.constant 0 : index
    %157 = vector.load %arg4[%c4_96, %c0_97, %c0_98] : memref<25x32x8xf32, #tpu.memory_space<vmem>>, vector<1x32x8xf32>
    %158 = vector.shape_cast %157 : vector<1x32x8xf32> to vector<32x8xf32>
    %159 = vector.extract_strided_slice %137 {offsets = [0, 8], sizes = [8, 128], strides = [1, 1]} : vector<8x448xf32> to vector<8x128xf32>
    %cst_99 = arith.constant dense<0.000000e+00> : vector<32x128xf32>
    %160 = tpu.matmul %158, %159, %cst_99 {dimension_numbers = #tpu.dot_dimension_numbers<[1], [0], [0], [1], [0, 0, 1, 1], [], []>} : vector<32x8xf32>, vector<8x128xf32>, vector<32x128xf32> -> vector<32x128xf32>
    %161 = arith.addf %156, %160 : vector<32x128xf32>
    %c5_100 = arith.constant 5 : index
    %c0_101 = arith.constant 0 : index
    %c0_102 = arith.constant 0 : index
    %162 = vector.load %arg4[%c5_100, %c0_101, %c0_102] : memref<25x32x8xf32, #tpu.memory_space<vmem>>, vector<1x32x8xf32>
    %163 = vector.shape_cast %162 : vector<1x32x8xf32> to vector<32x8xf32>
    %164 = vector.extract_strided_slice %137 {offsets = [0, 64], sizes = [8, 128], strides = [1, 1]} : vector<8x448xf32> to vector<8x128xf32>
    %cst_103 = arith.constant dense<0.000000e+00> : vector<32x128xf32>
    %165 = tpu.matmul %163, %164, %cst_103 {dimension_numbers = #tpu.dot_dimension_numbers<[1], [0], [0], [1], [0, 0, 1, 1], [], []>} : vector<32x8xf32>, vector<8x128xf32>, vector<32x128xf32> -> vector<32x128xf32>
    %166 = arith.addf %161, %165 : vector<32x128xf32>
    %c6_104 = arith.constant 6 : index
    %c0_105 = arith.constant 0 : index
    %c0_106 = arith.constant 0 : index
    %167 = vector.load %arg4[%c6_104, %c0_105, %c0_106] : memref<25x32x8xf32, #tpu.memory_space<vmem>>, vector<1x32x8xf32>
    %168 = vector.shape_cast %167 : vector<1x32x8xf32> to vector<32x8xf32>
    %169 = vector.extract_strided_slice %137 {offsets = [0, 66], sizes = [8, 128], strides = [1, 1]} : vector<8x448xf32> to vector<8x128xf32>
    %cst_107 = arith.constant dense<0.000000e+00> : vector<32x128xf32>
    %170 = tpu.matmul %168, %169, %cst_107 {dimension_numbers = #tpu.dot_dimension_numbers<[1], [0], [0], [1], [0, 0, 1, 1], [], []>} : vector<32x8xf32>, vector<8x128xf32>, vector<32x128xf32> -> vector<32x128xf32>
    %171 = arith.addf %166, %170 : vector<32x128xf32>
    %c7_108 = arith.constant 7 : index
    %c0_109 = arith.constant 0 : index
    %c0_110 = arith.constant 0 : index
    %172 = vector.load %arg4[%c7_108, %c0_109, %c0_110] : memref<25x32x8xf32, #tpu.memory_space<vmem>>, vector<1x32x8xf32>
    %173 = vector.shape_cast %172 : vector<1x32x8xf32> to vector<32x8xf32>
    %174 = vector.extract_strided_slice %137 {offsets = [0, 68], sizes = [8, 128], strides = [1, 1]} : vector<8x448xf32> to vector<8x128xf32>
    %cst_111 = arith.constant dense<0.000000e+00> : vector<32x128xf32>
    %175 = tpu.matmul %173, %174, %cst_111 {dimension_numbers = #tpu.dot_dimension_numbers<[1], [0], [0], [1], [0, 0, 1, 1], [], []>} : vector<32x8xf32>, vector<8x128xf32>, vector<32x128xf32> -> vector<32x128xf32>
    %176 = arith.addf %171, %175 : vector<32x128xf32>
    %c8_112 = arith.constant 8 : index
    %c0_113 = arith.constant 0 : index
    %c0_114 = arith.constant 0 : index
    %177 = vector.load %arg4[%c8_112, %c0_113, %c0_114] : memref<25x32x8xf32, #tpu.memory_space<vmem>>, vector<1x32x8xf32>
    %178 = vector.shape_cast %177 : vector<1x32x8xf32> to vector<32x8xf32>
    %179 = vector.extract_strided_slice %137 {offsets = [0, 70], sizes = [8, 128], strides = [1, 1]} : vector<8x448xf32> to vector<8x128xf32>
    %cst_115 = arith.constant dense<0.000000e+00> : vector<32x128xf32>
    %180 = tpu.matmul %178, %179, %cst_115 {dimension_numbers = #tpu.dot_dimension_numbers<[1], [0], [0], [1], [0, 0, 1, 1], [], []>} : vector<32x8xf32>, vector<8x128xf32>, vector<32x128xf32> -> vector<32x128xf32>
    %181 = arith.addf %176, %180 : vector<32x128xf32>
    %c9_116 = arith.constant 9 : index
    %c0_117 = arith.constant 0 : index
    %c0_118 = arith.constant 0 : index
    %182 = vector.load %arg4[%c9_116, %c0_117, %c0_118] : memref<25x32x8xf32, #tpu.memory_space<vmem>>, vector<1x32x8xf32>
    %183 = vector.shape_cast %182 : vector<1x32x8xf32> to vector<32x8xf32>
    %184 = vector.extract_strided_slice %137 {offsets = [0, 72], sizes = [8, 128], strides = [1, 1]} : vector<8x448xf32> to vector<8x128xf32>
    %cst_119 = arith.constant dense<0.000000e+00> : vector<32x128xf32>
    %185 = tpu.matmul %183, %184, %cst_119 {dimension_numbers = #tpu.dot_dimension_numbers<[1], [0], [0], [1], [0, 0, 1, 1], [], []>} : vector<32x8xf32>, vector<8x128xf32>, vector<32x128xf32> -> vector<32x128xf32>
    %186 = arith.addf %181, %185 : vector<32x128xf32>
    %c10_120 = arith.constant 10 : index
    %c0_121 = arith.constant 0 : index
    %c0_122 = arith.constant 0 : index
    %187 = vector.load %arg4[%c10_120, %c0_121, %c0_122] : memref<25x32x8xf32, #tpu.memory_space<vmem>>, vector<1x32x8xf32>
    %188 = vector.shape_cast %187 : vector<1x32x8xf32> to vector<32x8xf32>
    %189 = vector.extract_strided_slice %137 {offsets = [0, 128], sizes = [8, 128], strides = [1, 1]} : vector<8x448xf32> to vector<8x128xf32>
    %cst_123 = arith.constant dense<0.000000e+00> : vector<32x128xf32>
    %190 = tpu.matmul %188, %189, %cst_123 {dimension_numbers = #tpu.dot_dimension_numbers<[1], [0], [0], [1], [0, 0, 1, 1], [], []>} : vector<32x8xf32>, vector<8x128xf32>, vector<32x128xf32> -> vector<32x128xf32>
    %191 = arith.addf %186, %190 : vector<32x128xf32>
    %c11_124 = arith.constant 11 : index
    %c0_125 = arith.constant 0 : index
    %c0_126 = arith.constant 0 : index
    %192 = vector.load %arg4[%c11_124, %c0_125, %c0_126] : memref<25x32x8xf32, #tpu.memory_space<vmem>>, vector<1x32x8xf32>
    %193 = vector.shape_cast %192 : vector<1x32x8xf32> to vector<32x8xf32>
    %194 = vector.extract_strided_slice %137 {offsets = [0, 130], sizes = [8, 128], strides = [1, 1]} : vector<8x448xf32> to vector<8x128xf32>
    %cst_127 = arith.constant dense<0.000000e+00> : vector<32x128xf32>
    %195 = tpu.matmul %193, %194, %cst_127 {dimension_numbers = #tpu.dot_dimension_numbers<[1], [0], [0], [1], [0, 0, 1, 1], [], []>} : vector<32x8xf32>, vector<8x128xf32>, vector<32x128xf32> -> vector<32x128xf32>
    %196 = arith.addf %191, %195 : vector<32x128xf32>
    %c12_128 = arith.constant 12 : index
    %c0_129 = arith.constant 0 : index
    %c0_130 = arith.constant 0 : index
    %197 = vector.load %arg4[%c12_128, %c0_129, %c0_130] : memref<25x32x8xf32, #tpu.memory_space<vmem>>, vector<1x32x8xf32>
    %198 = vector.shape_cast %197 : vector<1x32x8xf32> to vector<32x8xf32>
    %199 = vector.extract_strided_slice %137 {offsets = [0, 132], sizes = [8, 128], strides = [1, 1]} : vector<8x448xf32> to vector<8x128xf32>
    %cst_131 = arith.constant dense<0.000000e+00> : vector<32x128xf32>
    %200 = tpu.matmul %198, %199, %cst_131 {dimension_numbers = #tpu.dot_dimension_numbers<[1], [0], [0], [1], [0, 0, 1, 1], [], []>} : vector<32x8xf32>, vector<8x128xf32>, vector<32x128xf32> -> vector<32x128xf32>
    %201 = arith.addf %196, %200 : vector<32x128xf32>
    %c13_132 = arith.constant 13 : index
    %c0_133 = arith.constant 0 : index
    %c0_134 = arith.constant 0 : index
    %202 = vector.load %arg4[%c13_132, %c0_133, %c0_134] : memref<25x32x8xf32, #tpu.memory_space<vmem>>, vector<1x32x8xf32>
    %203 = vector.shape_cast %202 : vector<1x32x8xf32> to vector<32x8xf32>
    %204 = vector.extract_strided_slice %137 {offsets = [0, 134], sizes = [8, 128], strides = [1, 1]} : vector<8x448xf32> to vector<8x128xf32>
    %cst_135 = arith.constant dense<0.000000e+00> : vector<32x128xf32>
    %205 = tpu.matmul %203, %204, %cst_135 {dimension_numbers = #tpu.dot_dimension_numbers<[1], [0], [0], [1], [0, 0, 1, 1], [], []>} : vector<32x8xf32>, vector<8x128xf32>, vector<32x128xf32> -> vector<32x128xf32>
    %206 = arith.addf %201, %205 : vector<32x128xf32>
    %c14_136 = arith.constant 14 : index
    %c0_137 = arith.constant 0 : index
    %c0_138 = arith.constant 0 : index
    %207 = vector.load %arg4[%c14_136, %c0_137, %c0_138] : memref<25x32x8xf32, #tpu.memory_space<vmem>>, vector<1x32x8xf32>
    %208 = vector.shape_cast %207 : vector<1x32x8xf32> to vector<32x8xf32>
    %209 = vector.extract_strided_slice %137 {offsets = [0, 136], sizes = [8, 128], strides = [1, 1]} : vector<8x448xf32> to vector<8x128xf32>
    %cst_139 = arith.constant dense<0.000000e+00> : vector<32x128xf32>
    %210 = tpu.matmul %208, %209, %cst_139 {dimension_numbers = #tpu.dot_dimension_numbers<[1], [0], [0], [1], [0, 0, 1, 1], [], []>} : vector<32x8xf32>, vector<8x128xf32>, vector<32x128xf32> -> vector<32x128xf32>
    %211 = arith.addf %206, %210 : vector<32x128xf32>
    %c15_140 = arith.constant 15 : index
    %c0_141 = arith.constant 0 : index
    %c0_142 = arith.constant 0 : index
    %212 = vector.load %arg4[%c15_140, %c0_141, %c0_142] : memref<25x32x8xf32, #tpu.memory_space<vmem>>, vector<1x32x8xf32>
    %213 = vector.shape_cast %212 : vector<1x32x8xf32> to vector<32x8xf32>
    %214 = vector.extract_strided_slice %137 {offsets = [0, 192], sizes = [8, 128], strides = [1, 1]} : vector<8x448xf32> to vector<8x128xf32>
    %cst_143 = arith.constant dense<0.000000e+00> : vector<32x128xf32>
    %215 = tpu.matmul %213, %214, %cst_143 {dimension_numbers = #tpu.dot_dimension_numbers<[1], [0], [0], [1], [0, 0, 1, 1], [], []>} : vector<32x8xf32>, vector<8x128xf32>, vector<32x128xf32> -> vector<32x128xf32>
    %216 = arith.addf %211, %215 : vector<32x128xf32>
    %c16_144 = arith.constant 16 : index
    %c0_145 = arith.constant 0 : index
    %c0_146 = arith.constant 0 : index
    %217 = vector.load %arg4[%c16_144, %c0_145, %c0_146] : memref<25x32x8xf32, #tpu.memory_space<vmem>>, vector<1x32x8xf32>
    %218 = vector.shape_cast %217 : vector<1x32x8xf32> to vector<32x8xf32>
    %219 = vector.extract_strided_slice %137 {offsets = [0, 194], sizes = [8, 128], strides = [1, 1]} : vector<8x448xf32> to vector<8x128xf32>
    %cst_147 = arith.constant dense<0.000000e+00> : vector<32x128xf32>
    %220 = tpu.matmul %218, %219, %cst_147 {dimension_numbers = #tpu.dot_dimension_numbers<[1], [0], [0], [1], [0, 0, 1, 1], [], []>} : vector<32x8xf32>, vector<8x128xf32>, vector<32x128xf32> -> vector<32x128xf32>
    %221 = arith.addf %216, %220 : vector<32x128xf32>
    %c17_148 = arith.constant 17 : index
    %c0_149 = arith.constant 0 : index
    %c0_150 = arith.constant 0 : index
    %222 = vector.load %arg4[%c17_148, %c0_149, %c0_150] : memref<25x32x8xf32, #tpu.memory_space<vmem>>, vector<1x32x8xf32>
    %223 = vector.shape_cast %222 : vector<1x32x8xf32> to vector<32x8xf32>
    %224 = vector.extract_strided_slice %137 {offsets = [0, 196], sizes = [8, 128], strides = [1, 1]} : vector<8x448xf32> to vector<8x128xf32>
    %cst_151 = arith.constant dense<0.000000e+00> : vector<32x128xf32>
    %225 = tpu.matmul %223, %224, %cst_151 {dimension_numbers = #tpu.dot_dimension_numbers<[1], [0], [0], [1], [0, 0, 1, 1], [], []>} : vector<32x8xf32>, vector<8x128xf32>, vector<32x128xf32> -> vector<32x128xf32>
    %226 = arith.addf %221, %225 : vector<32x128xf32>
    %c18_152 = arith.constant 18 : index
    %c0_153 = arith.constant 0 : index
    %c0_154 = arith.constant 0 : index
    %227 = vector.load %arg4[%c18_152, %c0_153, %c0_154] : memref<25x32x8xf32, #tpu.memory_space<vmem>>, vector<1x32x8xf32>
    %228 = vector.shape_cast %227 : vector<1x32x8xf32> to vector<32x8xf32>
    %229 = vector.extract_strided_slice %137 {offsets = [0, 198], sizes = [8, 128], strides = [1, 1]} : vector<8x448xf32> to vector<8x128xf32>
    %cst_155 = arith.constant dense<0.000000e+00> : vector<32x128xf32>
    %230 = tpu.matmul %228, %229, %cst_155 {dimension_numbers = #tpu.dot_dimension_numbers<[1], [0], [0], [1], [0, 0, 1, 1], [], []>} : vector<32x8xf32>, vector<8x128xf32>, vector<32x128xf32> -> vector<32x128xf32>
    %231 = arith.addf %226, %230 : vector<32x128xf32>
    %c19_156 = arith.constant 19 : index
    %c0_157 = arith.constant 0 : index
    %c0_158 = arith.constant 0 : index
    %232 = vector.load %arg4[%c19_156, %c0_157, %c0_158] : memref<25x32x8xf32, #tpu.memory_space<vmem>>, vector<1x32x8xf32>
    %233 = vector.shape_cast %232 : vector<1x32x8xf32> to vector<32x8xf32>
    %234 = vector.extract_strided_slice %137 {offsets = [0, 200], sizes = [8, 128], strides = [1, 1]} : vector<8x448xf32> to vector<8x128xf32>
    %cst_159 = arith.constant dense<0.000000e+00> : vector<32x128xf32>
    %235 = tpu.matmul %233, %234, %cst_159 {dimension_numbers = #tpu.dot_dimension_numbers<[1], [0], [0], [1], [0, 0, 1, 1], [], []>} : vector<32x8xf32>, vector<8x128xf32>, vector<32x128xf32> -> vector<32x128xf32>
    %236 = arith.addf %231, %235 : vector<32x128xf32>
    %c20_160 = arith.constant 20 : index
    %c0_161 = arith.constant 0 : index
    %c0_162 = arith.constant 0 : index
    %237 = vector.load %arg4[%c20_160, %c0_161, %c0_162] : memref<25x32x8xf32, #tpu.memory_space<vmem>>, vector<1x32x8xf32>
    %238 = vector.shape_cast %237 : vector<1x32x8xf32> to vector<32x8xf32>
    %239 = vector.extract_strided_slice %137 {offsets = [0, 256], sizes = [8, 128], strides = [1, 1]} : vector<8x448xf32> to vector<8x128xf32>
    %cst_163 = arith.constant dense<0.000000e+00> : vector<32x128xf32>
    %240 = tpu.matmul %238, %239, %cst_163 {dimension_numbers = #tpu.dot_dimension_numbers<[1], [0], [0], [1], [0, 0, 1, 1], [], []>} : vector<32x8xf32>, vector<8x128xf32>, vector<32x128xf32> -> vector<32x128xf32>
    %241 = arith.addf %236, %240 : vector<32x128xf32>
    %c21_164 = arith.constant 21 : index
    %c0_165 = arith.constant 0 : index
    %c0_166 = arith.constant 0 : index
    %242 = vector.load %arg4[%c21_164, %c0_165, %c0_166] : memref<25x32x8xf32, #tpu.memory_space<vmem>>, vector<1x32x8xf32>
    %243 = vector.shape_cast %242 : vector<1x32x8xf32> to vector<32x8xf32>
    %244 = vector.extract_strided_slice %137 {offsets = [0, 258], sizes = [8, 128], strides = [1, 1]} : vector<8x448xf32> to vector<8x128xf32>
    %cst_167 = arith.constant dense<0.000000e+00> : vector<32x128xf32>
    %245 = tpu.matmul %243, %244, %cst_167 {dimension_numbers = #tpu.dot_dimension_numbers<[1], [0], [0], [1], [0, 0, 1, 1], [], []>} : vector<32x8xf32>, vector<8x128xf32>, vector<32x128xf32> -> vector<32x128xf32>
    %246 = arith.addf %241, %245 : vector<32x128xf32>
    %c22_168 = arith.constant 22 : index
    %c0_169 = arith.constant 0 : index
    %c0_170 = arith.constant 0 : index
    %247 = vector.load %arg4[%c22_168, %c0_169, %c0_170] : memref<25x32x8xf32, #tpu.memory_space<vmem>>, vector<1x32x8xf32>
    %248 = vector.shape_cast %247 : vector<1x32x8xf32> to vector<32x8xf32>
    %249 = vector.extract_strided_slice %137 {offsets = [0, 260], sizes = [8, 128], strides = [1, 1]} : vector<8x448xf32> to vector<8x128xf32>
    %cst_171 = arith.constant dense<0.000000e+00> : vector<32x128xf32>
    %250 = tpu.matmul %248, %249, %cst_171 {dimension_numbers = #tpu.dot_dimension_numbers<[1], [0], [0], [1], [0, 0, 1, 1], [], []>} : vector<32x8xf32>, vector<8x128xf32>, vector<32x128xf32> -> vector<32x128xf32>
    %251 = arith.addf %246, %250 : vector<32x128xf32>
    %c23_172 = arith.constant 23 : index
    %c0_173 = arith.constant 0 : index
    %c0_174 = arith.constant 0 : index
    %252 = vector.load %arg4[%c23_172, %c0_173, %c0_174] : memref<25x32x8xf32, #tpu.memory_space<vmem>>, vector<1x32x8xf32>
    %253 = vector.shape_cast %252 : vector<1x32x8xf32> to vector<32x8xf32>
    %254 = vector.extract_strided_slice %137 {offsets = [0, 262], sizes = [8, 128], strides = [1, 1]} : vector<8x448xf32> to vector<8x128xf32>
    %cst_175 = arith.constant dense<0.000000e+00> : vector<32x128xf32>
    %255 = tpu.matmul %253, %254, %cst_175 {dimension_numbers = #tpu.dot_dimension_numbers<[1], [0], [0], [1], [0, 0, 1, 1], [], []>} : vector<32x8xf32>, vector<8x128xf32>, vector<32x128xf32> -> vector<32x128xf32>
    %256 = arith.addf %251, %255 : vector<32x128xf32>
    %c24_176 = arith.constant 24 : index
    %c0_177 = arith.constant 0 : index
    %c0_178 = arith.constant 0 : index
    %257 = vector.load %arg4[%c24_176, %c0_177, %c0_178] : memref<25x32x8xf32, #tpu.memory_space<vmem>>, vector<1x32x8xf32>
    %258 = vector.shape_cast %257 : vector<1x32x8xf32> to vector<32x8xf32>
    %259 = vector.extract_strided_slice %137 {offsets = [0, 264], sizes = [8, 128], strides = [1, 1]} : vector<8x448xf32> to vector<8x128xf32>
    %cst_179 = arith.constant dense<0.000000e+00> : vector<32x128xf32>
    %260 = tpu.matmul %258, %259, %cst_179 {dimension_numbers = #tpu.dot_dimension_numbers<[1], [0], [0], [1], [0, 0, 1, 1], [], []>} : vector<32x8xf32>, vector<8x128xf32>, vector<32x128xf32> -> vector<32x128xf32>
    %261 = arith.addf %256, %260 : vector<32x128xf32>
    %c0_180 = arith.constant 0 : index
    %c0_181 = arith.constant 0 : index
    %262 = vector.load %arg5[%c0_180, %c0_181] : memref<32x1xf32, #tpu.memory_space<vmem>>, vector<32x1xf32>
    %263 = vector.broadcast %262 : vector<32x1xf32> to vector<32x128xf32>
    %264 = arith.addf %261, %263 : vector<32x128xf32>
    %cst_182 = arith.constant 0.000000e+00 : f32
    %265 = vector.broadcast %cst_182 : f32 to vector<32x128xf32>
    %266 = arith.maximumf %264, %265 : vector<32x128xf32>
    %267 = vector.extract_strided_slice %266 {offsets = [0, 0], sizes = [32, 32], strides = [1, 1]} : vector<32x128xf32> to vector<32x32xf32>
    %268 = vector.extract_strided_slice %266 {offsets = [0, 2], sizes = [32, 32], strides = [1, 1]} : vector<32x128xf32> to vector<32x32xf32>
    %269 = arith.maximumf %267, %268 : vector<32x32xf32>
    %270 = vector.extract_strided_slice %266 {offsets = [0, 64], sizes = [32, 32], strides = [1, 1]} : vector<32x128xf32> to vector<32x32xf32>
    %271 = arith.maximumf %269, %270 : vector<32x32xf32>
    %272 = vector.extract_strided_slice %266 {offsets = [0, 66], sizes = [32, 32], strides = [1, 1]} : vector<32x128xf32> to vector<32x32xf32>
    %273 = arith.maximumf %271, %272 : vector<32x32xf32>
    %274 = tpu.transpose %273, [1, 0] : vector<32x32xf32> -> vector<32x32xf32>
    %275 = vector.extract_strided_slice %274 {offsets = [0, 0], sizes = [1, 32], strides = [1, 1]} : vector<32x32xf32> to vector<1x32xf32>
    %c0_183 = arith.constant 0 : index
    %c0_184 = arith.constant 0 : index
    %c0_185 = arith.constant 0 : index
    %276 = vector.load %arg6[%c0_183, %c0_184, %c0_185] : memref<5x32x128xf32, #tpu.memory_space<vmem>>, vector<1x32x128xf32>
    %277 = vector.shape_cast %276 : vector<1x32x128xf32> to vector<32x128xf32>
    %cst_186 = arith.constant dense<0.000000e+00> : vector<1x128xf32>
    %278 = tpu.matmul %275, %277, %cst_186 {dimension_numbers = #tpu.dot_dimension_numbers<[1], [0], [0], [1], [0, 0, 1, 1], [], []>} : vector<1x32xf32>, vector<32x128xf32>, vector<1x128xf32> -> vector<1x128xf32>
    %279 = vector.extract_strided_slice %274 {offsets = [4, 0], sizes = [1, 32], strides = [1, 1]} : vector<32x32xf32> to vector<1x32xf32>
    %c1_187 = arith.constant 1 : index
    %c0_188 = arith.constant 0 : index
    %c0_189 = arith.constant 0 : index
    %280 = vector.load %arg6[%c1_187, %c0_188, %c0_189] : memref<5x32x128xf32, #tpu.memory_space<vmem>>, vector<1x32x128xf32>
    %281 = vector.shape_cast %280 : vector<1x32x128xf32> to vector<32x128xf32>
    %cst_190 = arith.constant dense<0.000000e+00> : vector<1x128xf32>
    %282 = tpu.matmul %279, %281, %cst_190 {dimension_numbers = #tpu.dot_dimension_numbers<[1], [0], [0], [1], [0, 0, 1, 1], [], []>} : vector<1x32xf32>, vector<32x128xf32>, vector<1x128xf32> -> vector<1x128xf32>
    %283 = arith.addf %278, %282 : vector<1x128xf32>
    %284 = vector.extract_strided_slice %274 {offsets = [8, 0], sizes = [1, 32], strides = [1, 1]} : vector<32x32xf32> to vector<1x32xf32>
    %c2_191 = arith.constant 2 : index
    %c0_192 = arith.constant 0 : index
    %c0_193 = arith.constant 0 : index
    %285 = vector.load %arg6[%c2_191, %c0_192, %c0_193] : memref<5x32x128xf32, #tpu.memory_space<vmem>>, vector<1x32x128xf32>
    %286 = vector.shape_cast %285 : vector<1x32x128xf32> to vector<32x128xf32>
    %cst_194 = arith.constant dense<0.000000e+00> : vector<1x128xf32>
    %287 = tpu.matmul %284, %286, %cst_194 {dimension_numbers = #tpu.dot_dimension_numbers<[1], [0], [0], [1], [0, 0, 1, 1], [], []>} : vector<1x32xf32>, vector<32x128xf32>, vector<1x128xf32> -> vector<1x128xf32>
    %288 = arith.addf %283, %287 : vector<1x128xf32>
    %289 = vector.extract_strided_slice %274 {offsets = [12, 0], sizes = [1, 32], strides = [1, 1]} : vector<32x32xf32> to vector<1x32xf32>
    %c3_195 = arith.constant 3 : index
    %c0_196 = arith.constant 0 : index
    %c0_197 = arith.constant 0 : index
    %290 = vector.load %arg6[%c3_195, %c0_196, %c0_197] : memref<5x32x128xf32, #tpu.memory_space<vmem>>, vector<1x32x128xf32>
    %291 = vector.shape_cast %290 : vector<1x32x128xf32> to vector<32x128xf32>
    %cst_198 = arith.constant dense<0.000000e+00> : vector<1x128xf32>
    %292 = tpu.matmul %289, %291, %cst_198 {dimension_numbers = #tpu.dot_dimension_numbers<[1], [0], [0], [1], [0, 0, 1, 1], [], []>} : vector<1x32xf32>, vector<32x128xf32>, vector<1x128xf32> -> vector<1x128xf32>
    %293 = arith.addf %288, %292 : vector<1x128xf32>
    %294 = vector.extract_strided_slice %274 {offsets = [16, 0], sizes = [1, 32], strides = [1, 1]} : vector<32x32xf32> to vector<1x32xf32>
    %c4_199 = arith.constant 4 : index
    %c0_200 = arith.constant 0 : index
    %c0_201 = arith.constant 0 : index
    %295 = vector.load %arg6[%c4_199, %c0_200, %c0_201] : memref<5x32x128xf32, #tpu.memory_space<vmem>>, vector<1x32x128xf32>
    %296 = vector.shape_cast %295 : vector<1x32x128xf32> to vector<32x128xf32>
    %cst_202 = arith.constant dense<0.000000e+00> : vector<1x128xf32>
    %297 = tpu.matmul %294, %296, %cst_202 {dimension_numbers = #tpu.dot_dimension_numbers<[1], [0], [0], [1], [0, 0, 1, 1], [], []>} : vector<1x32xf32>, vector<32x128xf32>, vector<1x128xf32> -> vector<1x128xf32>
    %298 = arith.addf %293, %297 : vector<1x128xf32>
    %c0_203 = arith.constant 0 : index
    %c0_204 = arith.constant 0 : index
    %299 = vector.load %arg7[%c0_203, %c0_204] : memref<1x128xf32, #tpu.memory_space<vmem>>, vector<1x128xf32>
    %300 = arith.addf %298, %299 : vector<1x128xf32>
    %cst_205 = arith.constant 0.000000e+00 : f32
    %301 = vector.broadcast %cst_205 : f32 to vector<1x128xf32>
    %302 = arith.maximumf %300, %301 : vector<1x128xf32>
    %c0_206 = arith.constant 0 : index
    %c0_207 = arith.constant 0 : index
    %c0_208 = arith.constant 0 : index
    %303 = vector.load %arg8[%c0_206, %c0_207, %c0_208] : memref<1x1x128xf32, #tpu.memory_space<vmem>>, vector<1x1x128xf32>
    %304 = vector.shape_cast %303 : vector<1x1x128xf32> to vector<1x128xf32>
    %305 = vector.shape_cast %302 : vector<1x128xf32> to vector<1x1x128xf32>
    tpu.vector_store %arg8[%c0_206, %c0_207, %c0_208], %305 {strides = array<i32>} : memref<1x1x128xf32, #tpu.memory_space<vmem>>, vector<1x1x128xf32>,
    return
  }
  func.func @transform_0(%arg0: i32) -> (i32, i32, i32) {
    %c0_i32 = arith.constant 0 : i32
    %c0_i32_0 = arith.constant 0 : i32
    %c0_i32_1 = arith.constant 0 : i32
    return %arg0, %c0_i32, %c0_i32_0 : i32, i32, i32
  }
  func.func @transform_1(%arg0: i32) -> (i32, i32, i32) {
    %c0_i32 = arith.constant 0 : i32
    %c0_i32_0 = arith.constant 0 : i32
    %c0_i32_1 = arith.constant 0 : i32
    %c0_i32_2 = arith.constant 0 : i32
    return %c0_i32, %c0_i32_0, %c0_i32_1 : i32, i32, i32
  }
  func.func @transform_2(%arg0: i32) -> (i32, i32) {
    %c0_i32 = arith.constant 0 : i32
    %c0_i32_0 = arith.constant 0 : i32
    %c0_i32_1 = arith.constant 0 : i32
    return %c0_i32, %c0_i32_0 : i32, i32
  }
  func.func @transform_3(%arg0: i32) -> (i32, i32, i32) {
    %c0_i32 = arith.constant 0 : i32
    %c0_i32_0 = arith.constant 0 : i32
    %c0_i32_1 = arith.constant 0 : i32
    %c0_i32_2 = arith.constant 0 : i32
    return %c0_i32, %c0_i32_0, %c0_i32_1 : i32, i32, i32
  }
  func.func @transform_4(%arg0: i32) -> (i32, i32) {
    %c0_i32 = arith.constant 0 : i32
    %c0_i32_0 = arith.constant 0 : i32
    %c0_i32_1 = arith.constant 0 : i32
    return %c0_i32, %c0_i32_0 : i32, i32
  }
  func.func @transform_5(%arg0: i32) -> (i32, i32, i32) {
    %c0_i32 = arith.constant 0 : i32
    %c0_i32_0 = arith.constant 0 : i32
    %c0_i32_1 = arith.constant 0 : i32
    %c0_i32_2 = arith.constant 0 : i32
    return %c0_i32, %c0_i32_0, %c0_i32_1 : i32, i32, i32
  }
  func.func @transform_6(%arg0: i32) -> (i32, i32) {
    %c0_i32 = arith.constant 0 : i32
    %c0_i32_0 = arith.constant 0 : i32
    %c0_i32_1 = arith.constant 0 : i32
    return %c0_i32, %c0_i32_0 : i32, i32
  }
  func.func @transform_7(%arg0: i32) -> (i32, i32, i32) {
    %c0_i32 = arith.constant 0 : i32
    %c0_i32_0 = arith.constant 0 : i32
    %c0_i32_1 = arith.constant 0 : i32
    return %arg0, %c0_i32, %c0_i32_0 : i32, i32, i32
  }
}

</mosaic_0001>

<bundles_post_ra>
// kernel: simple_cnn_forward.1
= control target key start
LH: loop header
LB: loop body
LE: loop exit
PB: predicated region body
PF: predicated region fallthrough
CT: control target
= control target key end

     0   :  { %12 = vsyncpa [#allocation3], 0  ;;  %s10227_s0 = inlined_call_operand.vmem [shape: f32[2,8,768], index: 0, kind: input, shape index: {}]   ;;  %s10228_s1 = inlined_call_operand.vmem [shape: f32[25,8,8], index: 1, kind: input, shape index: {}]   ;;  %s10229_s2 = inlined_call_operand.vmem [shape: f32[8,1], index: 2, kind: input, shape index: {}]   ;;  %s10230_s3 = inlined_call_operand.vmem [shape: f32[25,32,8], index: 3, kind: input, shape index: {}]   ;;  %s10231_s4 = inlined_call_operand.vmem [shape: f32[32,1], index: 4, kind: input, shape index: {}]   ;;  %s10232_s5 = inlined_call_operand.vmem [shape: f32[5,32,128], index: 5, kind: input, shape index: {}]   ;;  %s10233_s6 = inlined_call_operand.vmem [shape: f32[1,128], index: 6, kind: input, shape index: {}]   ;;  %s10234_s7 = inlined_call_operand.hbm [shape: f32[2,1,128], index: 7, kind: output, shape index: {}]  }
   0x1   :  { %14 = vsyncpa [#allocation3 + $0x1], 0  ;;  %s8969_s24 = smov 0   ;;  %s8971_s25 = smov 0  }
   0x2   :  { %s8973_s26 = smov 0   ;;  %s8975_s27 = smov 0  }
   0x3 LB: > { %s8990_s28 = sadd.s32 4294967295, %s8899_s27   ;;  %s7842_s29 = sadd.s32 4294967294, %s8899_s27   ;;  %s8899_s27 = sphi %s8975_s27, %s10240_s27   ;;  %s8895_s26 = sphi %s8973_s26, %s10239_s26   ;;  %s8891_s25 = sphi %s8971_s25, %s10238_s25   ;;  %s8887_s24 = sphi %s8969_s24, %s10237_s24  }
   0x4   : > { %s8994_s30 = sadd.s32 1, %s8899_s27   ;;  %s179_s8 = sadd.s32 1, %s8895_s26 }
   0x5   : > { %s176_s9 = ssub.s32 %s8899_s27, %s8994_s30  ;;  %p189_p0 = scmp.ne.s32.totalorder %s8895_s26, %s8891_s25 }
   0x6   : > { %p177_p1 = scmp.eq.s32.totalorder %s176_s9, 0  ;;  %p190_p2 = scmp.eq.s32.totalorder %s8990_s28, 1 }
   0x7   : > { %p195_p3 = scmp.ne.s32.totalorder %s8891_s25, %s8887_s24  ;;  %p196_p4 = scmp.eq.s32.totalorder %s7842_s29, 1 }
   0x8   : > { %s9005_s10 = scalar_select %p177_p1, %s8895_s26, %s179_s8  }
   0x9   : > { %p9007_p5 = por %p190_p2, %p189_p0  ;;  %p9011_p6 = por %p196_p4, %p195_p3 }
   0xa   : > { %p7845_p7 = scmp.ge.s32.totalorder %s8899_s27, 1  ;;  %p240_p8 = scmp.lt.s32.totalorder %s8899_s27, 3 }
   0xc   : > { %p241_p9 = pnand %p7845_p7, %p240_p8 }
   0xd   : > { %p271_p10 = scmp.lt.s32.totalorder (!%p241_p9), %s8990_s28, 1  ;;  %v8901_v0 = vmov (!%p241_p9), 0.0   ;;  %s8902_s18 = smov (!%p241_p9), 127   ;;  %vm300_vm0 = vcmask (!%p241_p9), 1039360   ;;  %v7847_v13 = vld [vmem:[%s10228_s1 + $0x8] sm:$0xff] (!%p241_p9)  ;;  %vm309_vm1 = vcmask (!%p241_p9), 64512  }
   0xe   : > { %244 = sbr.rel (%p241_p9) target bundleno = 1687 (0x697), region = 48  ;;  %377 = vmatprep.mubr.f32.mxu0 (!%p241_p9), %v8901_v0  ;;  %448 = vmatprep.mubr.f32.mxu1 (!%p241_p9), %v8901_v0  ;;  %s8903_s19 = smov (!%p241_p9), 126   ;;  %vm612_vm2 = vcmask (!%p241_p9), 1031168   ;;  %v282_v20 = vld [vmem:[%s10228_s1] sm:$0xff] (!%p241_p9)  ;;  %vm782_vm3 = vcmask (!%p241_p9), 1022976   ;;  %v7852_v29 = vld [vmem:[%s10228_s1 + $0x10] sm:$0xff] (!%p241_p9) }
   0xf   : > { %s8904_s20 = smov (!%p241_p9), 125   ;;  %s8905_s21 = smov (!%p241_p9), 124   ;;  %vm952_vm4 = vcmask (!%p241_p9), 1014784   ;;  %v7855_v37 = vld [vmem:[%s10228_s1 + $0x18] sm:$0xff] (!%p241_p9)  ;;  %vm1122_vm5 = vcmask (!%p241_p9), 785408   ;;  %v7858_v45 = vld [vmem:[%s10228_s1 + $0x20] sm:$0xff] (!%p241_p9) }
  0x10   : > { %s8906_s22 = smov (!%p241_p9), 96   ;;  %s8907_s23 = smov (!%p241_p9), 95   ;;  %v7861_v54 = vld [vmem:[%s10228_s1 + $0x28] sm:$0xff] (!%p241_p9)  ;;  %vm1292_vm6 = vcmask (!%p241_p9), 777216   ;;  %vm1462_vm7 = vcmask (!%p241_p9), 769024   ;;  %vm1632_vm8 = vcmask (!%p241_p9), 760832  }
  0x11   : > { %s8908_s29 = smov (!%p241_p9), 94   ;;  %s8909_s8 = smov (!%p241_p9), 93   ;;  %vm1802_vm9 = vcmask (!%p241_p9), 752640   ;;  %vm1972_vm10 = vcmask (!%p241_p9), 523264   ;;  %vm2142_vm11 = vcmask (!%p241_p9), 515072   ;;  %vm2312_vm12 = vcmask (!%p241_p9), 506880  }
  0x12   : > { %s8910_s9 = smov (!%p241_p9), 92   ;;  %s8913_s15 = smov (!%p241_p9), 62   ;;  %vm2482_vm13 = vcmask (!%p241_p9), 498688   ;;  %vm2652_vm14 = vcmask (!%p241_p9), 490496   ;;  %vm2822_vm15 = vcmask (!%p241_p9), 261120  }
  0x13   : > { %s8915_s16 = smov (!%p241_p9), 60  }
  0x15   : > { %s272_s13 = scalar_select %p271_p10, %s8990_s28, 1 }
  0x17   : > { %s8768_s14 = smul.u32 48, %s272_s13  ;;  %s8911_s13 = smov 64  }
  0x19   : > { %s9024_s17 = scalar_lea.vmem %s10227_s0, %s8768_s14  ;;  %s8912_s14 = smov 63  }
  0x1a   : > { %v9027_v1 = vld [vmem:[%s9024_s17 + $0x18] sm:$0xff]  ;;  %v9030_v2 = vld [vmem:[%s9024_s17 + $0x8] sm:$0xff]  ;;  %v9037_v3 = vld [vmem:[%s9024_s17 + $0x20] sm:$0xff] }
  0x1b   : > { %296 = vrot.lane.b32.xlu1 %v9027_v1, %s8902_s18  ;;  %292 = vrot.lane.b32.xlu0 %v9030_v2, %s8902_s18  ;;  %v9040_v4 = vld [vmem:[%s9024_s17 + $0x10] sm:$0xff]  ;;  %v9047_v5 = vld [vmem:[%s9024_s17] sm:$0xff] }
  0x1f   : > { %298 = vrot.lane.b32.xlu1 %v9037_v3, %s8902_s18  ;;  %294 = vrot.lane.b32.xlu0 %v9040_v4, %s8902_s18 }
  0x23   : > { %604 = vrot.lane.b32.xlu1 %v9030_v2, %s8903_s19  ;;  %290 = vrot.lane.b32.xlu0 %v9047_v5, %s8902_s18 }
  0x27   : > { %608 = vrot.lane.b32.xlu1 %v9027_v1, %s8903_s19  ;;  %606 = vrot.lane.b32.xlu0 %v9040_v4, %s8903_s19 }
  0x2b   : > { %602 = vrot.lane.b32.xlu1 %v9047_v5, %s8903_s19  ;;  %610 = vrot.lane.b32.xlu0 %v9037_v3, %s8903_s19 }
  0x2f   : > { %776 = vrot.lane.b32.xlu1 %v9040_v4, %s8904_s20  ;;  %774 = vrot.lane.b32.xlu0 %v9030_v2, %s8904_s20 }
  0x33   : > { %780 = vrot.lane.b32.xlu1 %v9037_v3, %s8904_s20  ;;  %778 = vrot.lane.b32.xlu0 %v9027_v1, %s8904_s20 }
  0x37   : > { %944 = vrot.lane.b32.xlu1 %v9030_v2, %s8905_s21  ;;  %772 = vrot.lane.b32.xlu0 %v9047_v5, %s8904_s20 }
  0x3b   : > { %948 = vrot.lane.b32.xlu1 %v9027_v1, %s8905_s21  ;;  %946 = vrot.lane.b32.xlu0 %v9040_v4, %s8905_s21 }
  0x3f   : > { %942 = vrot.lane.b32.xlu1 %v9047_v5, %s8905_s21  ;;  %950 = vrot.lane.b32.xlu0 %v9037_v3, %s8905_s21 }
  0x43   : > { %1116 = vrot.lane.b32.xlu1 %v9040_v4, %s8906_s22  ;;  %1114 = vrot.lane.b32.xlu0 %v9030_v2, %s8906_s22 }
  0x47   : > { %1120 = vrot.lane.b32.xlu1 %v9037_v3, %s8906_s22  ;;  %1118 = vrot.lane.b32.xlu0 %v9027_v1, %s8906_s22 }
  0x4b   : > { %1284 = vrot.lane.b32.xlu1 %v9030_v2, %s8907_s23  ;;  %1112 = vrot.lane.b32.xlu0 %v9047_v5, %s8906_s22 }
  0x4f   : > { %1288 = vrot.lane.b32.xlu1 %v9027_v1, %s8907_s23  ;;  %1286 = vrot.lane.b32.xlu0 %v9040_v4, %s8907_s23 }
  0x53   : > { %1282 = vrot.lane.b32.xlu1 %v9047_v5, %s8907_s23  ;;  %1290 = vrot.lane.b32.xlu0 %v9037_v3, %s8907_s23 }
  0x57   : > { %1456 = vrot.lane.b32.xlu1 %v9040_v4, %s8908_s29  ;;  %1454 = vrot.lane.b32.xlu0 %v9030_v2, %s8908_s29 }
  0x5b   : > { %1460 = vrot.lane.b32.xlu1 %v9037_v3, %s8908_s29  ;;  %1458 = vrot.lane.b32.xlu0 %v9027_v1, %s8908_s29 }
  0x5f   : > { %1624 = vrot.lane.b32.xlu1 %v9030_v2, %s8909_s8  ;;  %1452 = vrot.lane.b32.xlu0 %v9047_v5, %s8908_s29  ;;  %s8918_s29 = smov 30  }
  0x63   : > { %1628 = vrot.lane.b32.xlu1 %v9027_v1, %s8909_s8  ;;  %1626 = vrot.lane.b32.xlu0 %v9040_v4, %s8909_s8 }
  0x67   : > { %1622 = vrot.lane.b32.xlu1 %v9047_v5, %s8909_s8  ;;  %1630 = vrot.lane.b32.xlu0 %v9037_v3, %s8909_s8  ;;  %s8914_s8 = smov 61  }
  0x6b   : > { %1796 = vrot.lane.b32.xlu1 %v9040_v4, %s8910_s9  ;;  %1794 = vrot.lane.b32.xlu0 %v9030_v2, %s8910_s9 }
  0x6f   : > { %1800 = vrot.lane.b32.xlu1 %v9037_v3, %s8910_s9  ;;  %1798 = vrot.lane.b32.xlu0 %v9027_v1, %s8910_s9 }
  0x73   : > { %1964 = vrot.lane.b32.xlu1 %v9030_v2, %s8911_s13  ;;  %1792 = vrot.lane.b32.xlu0 %v9047_v5, %s8910_s9  ;;  %s8916_s9 = smov 32  }
  0x77   : > { %1968 = vrot.lane.b32.xlu1 %v9027_v1, %s8911_s13  ;;  %1966 = vrot.lane.b32.xlu0 %v9040_v4, %s8911_s13 }
  0x7b   : > { %1962 = vrot.lane.b32.xlu1 %v9047_v5, %s8911_s13  ;;  %1970 = vrot.lane.b32.xlu0 %v9037_v3, %s8911_s13 }
  0x7f   : > { %2136 = vrot.lane.b32.xlu1 %v9040_v4, %s8912_s14  ;;  %2134 = vrot.lane.b32.xlu0 %v9030_v2, %s8912_s14 }
  0x83   : > { %2140 = vrot.lane.b32.xlu1 %v9037_v3, %s8912_s14  ;;  %2138 = vrot.lane.b32.xlu0 %v9027_v1, %s8912_s14 }
  0x87   : > { %2304 = vrot.lane.b32.xlu1 %v9030_v2, %s8913_s15  ;;  %2132 = vrot.lane.b32.xlu0 %v9047_v5, %s8912_s14  ;;  %s8920_s14 = smov 28  }
  0x8b   : > { %2308 = vrot.lane.b32.xlu1 %v9027_v1, %s8913_s15  ;;  %2306 = vrot.lane.b32.xlu0 %v9040_v4, %s8913_s15 }
  0x8d   : > { %v297_v6 = vpop.permute.xlu1 %296  ;;  %v293_v7 = vpop.permute.xlu0 %292 }
  0x8f   : > { %2302 = vrot.lane.b32.xlu1 %v9047_v5, %s8913_s15  ;;  %2310 = vrot.lane.b32.xlu0 %v9037_v3, %s8913_s15 }
  0x91   : > { %v9141_v8 = vpop.permute.xlu1 %298  ;;  %v295_v9 = vpop.permute.xlu0 %294 }
  0x92   : > { %v9144_v10 = vsel %vm300_vm0, %v293_v7, %v295_v9  ;;  %v9148_v11 = vsel %vm300_vm0, %v297_v6, %v9141_v8  ;;  %v9151_v12 = vsel %vm300_vm0, %v295_v9, %v297_v6 }
  0x93   : > { %313 = vmatprep.subr.mxu0 %v9144_v10  ;;  %384 = vmatprep.subr.mxu1 %v9148_v11 }
  0x94   : > { %2476 = vrot.lane.b32.xlu1 %v9040_v4, %s8914_s8  ;;  %2474 = vrot.lane.b32.xlu0 %v9030_v2, %s8914_s8 }
  0x95   : > { %385 = vmatpush1.msra.mxu1 %v9151_v12  ;;  %v605_v14 = vpop.permute.xlu1 %604  ;;  %v291_v15 = vpop.permute.xlu0 %290 }
  0x96   : > { %v301_v16 = vsel %vm300_vm0, %v291_v15, %v293_v7  ;;  %7849 = vmatmul.mubr.msk.f32.vlgmr.msra.gmra.mrb[0].mxu1 %vm309_vm1, %v7847_v13  ;;  %529 = vmatprep.subr.mxu1 %v9027_v1  ;;  %v7864_v7 = vld [vmem:[%s10228_s1 + $0x30] sm:$0xff] }
  0x97   : > { %314 = vmatpush1.msra.mxu0 %v301_v16  ;;  %530 = vmatpush1.msra.mxu1 %v9040_v4 }
  0x98   : > { %2480 = vrot.lane.b32.xlu1 %v9037_v3, %s8914_s8  ;;  %2478 = vrot.lane.b32.xlu0 %v9027_v1, %s8914_s8 }
  0x99   : > { %7848 = vmatmul.mubr.msk.f32.vlgmr.msra.gmra.mrb[0].mxu0 %vm309_vm1, %v7847_v13  ;;  %v609_v17 = vpop.permute.xlu1 %608  ;;  %458 = vmatprep.subr.mxu0 %v9030_v2  ;;  %v607_v18 = vpop.permute.xlu0 %606 }
  0x9a   : > { %459 = vmatpush1.msra.mxu0 %v9047_v5  ;;  %v9171_v19 = vsel %vm612_vm2, %v605_v14, %v607_v18  ;;  %593 = vmatprep.mubr.f32.mxu1 %v8901_v0  ;;  %v9197_v25 = vsel %vm612_vm2, %v607_v18, %v609_v17 }
  0x9b   : > { %624 = vmatprep.subr.mxu0 %v9171_v19  ;;  %522 = vmatprep.mubr.f32.mxu0 %v8901_v0 }
  0x9c   : > { %2644 = vrot.lane.b32.xlu1 %v9030_v2, %s8915_s16  ;;  %2472 = vrot.lane.b32.xlu0 %v9047_v5, %s8914_s8  ;;  %s8917_s8 = smov 31  }
  0x9d   : > { %v603_v21 = vpop.permute.xlu1 %602  ;;  %v9182_v22 = vpop.permute.xlu0 %610 }
  0x9e   : > { %v9186_v23 = vsel %vm612_vm2, %v609_v17, %v9182_v22  ;;  %7851 = vmatmul.mubr.msk.f32.vlgmr.msra.gmra.mrb[0].mxu1 %vm309_vm1, %v282_v20  ;;  %v613_v24 = vsel %vm612_vm2, %v603_v21, %v605_v14  ;;  %v7867_v21 = vld [vmem:[%s10228_s1 + $0x38] sm:$0xff] }
  0x9f   : > { %695 = vmatprep.subr.mxu1 %v9186_v23  ;;  %759 = vmatprep.mubr.f32.mxu1 %v8901_v0 }
  0xa0   : > { %2648 = vrot.lane.b32.xlu1 %v9027_v1, %s8915_s16  ;;  %2646 = vrot.lane.b32.xlu0 %v9040_v4, %s8915_s16 }
  0xa1   : > { %7850 = vmatmul.mubr.msk.f32.vlgmr.msra.gmra.mrb[0].mxu0 %vm309_vm1, %v282_v20  ;;  %696 = vmatpush1.msra.mxu1 %v9197_v25  ;;  %v777_v26 = vpop.permute.xlu1 %776  ;;  %v775_v27 = vpop.permute.xlu0 %774 }
  0xa2   : > { %625 = vmatpush1.msra.mxu0 %v613_v24  ;;  %v9202_v28 = vsel %vm782_vm3, %v775_v27, %v777_v26  ;;  %688 = vmatprep.mubr.f32.mxu0 %v8901_v0 }
  0xa3   : > { %794 = vmatprep.subr.mxu0 %v9202_v28 }
  0xa4   : > { %2642 = vrot.lane.b32.xlu1 %v9047_v5, %s8915_s16  ;;  %2650 = vrot.lane.b32.xlu0 %v9037_v3, %s8915_s16 }
  0xa5   : > { %v9213_v30 = vpop.permute.xlu1 %780  ;;  %v779_v31 = vpop.permute.xlu0 %778 }
  0xa6   : > { %v9217_v32 = vsel %vm782_vm3, %v779_v31, %v9213_v30  ;;  %7854 = vmatmul.mubr.msk.f32.vlgmr.msra.gmra.mrb[0].mxu1 %vm309_vm1, %v7852_v29  ;;  %v9221_v33 = vsel %vm782_vm3, %v777_v26, %v779_v31 }
  0xa7   : > { %865 = vmatprep.subr.mxu1 %v9217_v32  ;;  %929 = vmatprep.mubr.f32.mxu1 %v8901_v0 }
  0xa8   : > { %2816 = vrot.lane.b32.xlu1 %v9040_v4, %s8916_s9  ;;  %2814 = vrot.lane.b32.xlu0 %v9030_v2, %s8916_s9 }
  0xa9   : > { %866 = vmatpush1.msra.mxu1 %v9221_v33  ;;  %v945_v34 = vpop.permute.xlu1 %944  ;;  %v773_v35 = vpop.permute.xlu0 %772  ;;  %7853 = vmatmul.mubr.msk.f32.vlgmr.msra.gmra.mrb[0].mxu0 %vm309_vm1, %v7852_v29 }
  0xaa   : > { %v783_v36 = vsel %vm782_vm3, %v773_v35, %v775_v27  ;;  %858 = vmatprep.mubr.f32.mxu0 %v8901_v0 }
  0xab   : > { %795 = vmatpush1.msra.mxu0 %v783_v36 }
  0xac   : > { %2820 = vrot.lane.b32.xlu1 %v9037_v3, %s8916_s9  ;;  %2818 = vrot.lane.b32.xlu0 %v9027_v1, %s8916_s9 }
  0xad   : > { %v949_v38 = vpop.permute.xlu1 %948  ;;  %v947_v39 = vpop.permute.xlu0 %946 }
  0xae   : > { %v9237_v40 = vsel %vm952_vm4, %v945_v34, %v947_v39  ;;  %7857 = vmatmul.mubr.msk.f32.vlgmr.msra.gmra.mrb[0].mxu1 %vm309_vm1, %v7855_v37  ;;  %v9260_v46 = vsel %vm952_vm4, %v947_v39, %v949_v38 }
  0xaf   : > { %964 = vmatprep.subr.mxu0 %v9237_v40  ;;  %1099 = vmatprep.mubr.f32.mxu1 %v8901_v0 }
  0xb0   : > { %2984 = vrot.lane.b32.xlu1 %v9030_v2, %s8917_s8  ;;  %2812 = vrot.lane.b32.xlu0 %v9047_v5, %s8916_s9 }
  0xb1   : > { %v943_v41 = vpop.permute.xlu1 %942  ;;  %v9244_v42 = vpop.permute.xlu0 %950  ;;  %7856 = vmatmul.mubr.msk.f32.vlgmr.msra.gmra.mrb[0].mxu0 %vm309_vm1, %v7855_v37 }
  0xb2   : > { %v953_v43 = vsel %vm952_vm4, %v943_v41, %v945_v34  ;;  %v9250_v44 = vsel %vm952_vm4, %v949_v38, %v9244_v42  ;;  %1028 = vmatprep.mubr.f32.mxu0 %v8901_v0  ;;  %v281_v34 = vld [vmem:[%s9024_s17 + $0x28] sm:$0xff]  ;;  %v7870_v41 = vld [vmem:[%s10228_s1 + $0x40] sm:$0xff] }
  0xb3   : > { %965 = vmatpush1.msra.mxu0 %v953_v43  ;;  %1035 = vmatprep.subr.mxu1 %v9250_v44 }
  0xb4   : > { %2988 = vrot.lane.b32.xlu1 %v9027_v1, %s8917_s8  ;;  %2986 = vrot.lane.b32.xlu0 %v9040_v4, %s8917_s8 }
  0xb5   : > { %1036 = vmatpush1.msra.mxu1 %v9260_v46  ;;  %v1117_v47 = vpop.permute.xlu1 %1116  ;;  %v1115_v48 = vpop.permute.xlu0 %1114 }
  0xb6   : > { %v1124_v49 = vsel %vm1122_vm5, %v1115_v48, %v1117_v47  ;;  %7860 = vmatmul.mubr.msk.f32.vlgmr.msra.gmra.mrb[0].mxu1 %vm309_vm1, %v7858_v45 }
  0xb7   : > { %1134 = vmatprep.subr.mxu0 %v1124_v49  ;;  %1269 = vmatprep.mubr.f32.mxu1 %v8901_v0 }
  0xb8   : > { %2982 = vrot.lane.b32.xlu1 %v9047_v5, %s8917_s8  ;;  %2990 = vrot.lane.b32.xlu0 %v9037_v3, %s8917_s8  ;;  %s8919_s8 = smov 29  }
  0xb9   : > { %v1121_v50 = vpop.permute.xlu1 %1120  ;;  %v1119_v51 = vpop.permute.xlu0 %1118  ;;  %7859 = vmatmul.mubr.msk.f32.vlgmr.msra.gmra.mrb[0].mxu0 %vm309_vm1, %v7858_v45 }
  0xba   : > { %v1126_v52 = vsel %vm1122_vm5, %v1119_v51, %v1121_v50  ;;  %v1125_v53 = vsel %vm1122_vm5, %v1117_v47, %v1119_v51  ;;  %1198 = vmatprep.mubr.f32.mxu0 %v8901_v0 }
  0xbb   : > { %1205 = vmatprep.subr.mxu1 %v1126_v52  ;;  %v7873_v52 = vld [vmem:[%s10228_s1 + $0x48] sm:$0xff] }
  0xbc   : > { %3156 = vrot.lane.b32.xlu1 %v9040_v4, %s8918_s29  ;;  %3154 = vrot.lane.b32.xlu0 %v9030_v2, %s8918_s29 }
  0xbd   : > { %1206 = vmatpush1.msra.mxu1 %v1125_v53  ;;  %v1285_v55 = vpop.permute.xlu1 %1284  ;;  %v1113_v56 = vpop.permute.xlu0 %1112 }
  0xbe   : > { %v1123_v57 = vsel %vm1122_vm5, %v1113_v56, %v1115_v48  ;;  %7863 = vmatmul.mubr.msk.f32.vlgmr.msra.gmra.mrb[0].mxu1 %vm309_vm1, %v7861_v54 }
  0xbf   : > { %1135 = vmatpush1.msra.mxu0 %v1123_v57  ;;  %1439 = vmatprep.mubr.f32.mxu1 %v8901_v0 }
  0xc0   : > { %3160 = vrot.lane.b32.xlu1 %v9037_v3, %s8918_s29  ;;  %3158 = vrot.lane.b32.xlu0 %v9027_v1, %s8918_s29 }
  0xc1   : > { %v1289_v58 = vpop.permute.xlu1 %1288  ;;  %v1287_v59 = vpop.permute.xlu0 %1286  ;;  %7862 = vmatmul.mubr.msk.f32.vlgmr.msra.gmra.mrb[0].mxu0 %vm309_vm1, %v7861_v54 }
  0xc2   : > { %v1294_v60 = vsel %vm1292_vm6, %v1285_v55, %v1287_v59  ;;  %1368 = vmatprep.mubr.f32.mxu0 %v8901_v0  ;;  %v1295_v9 = vsel %vm1292_vm6, %v1287_v59, %v1289_v58 }
  0xc3   : > { %1304 = vmatprep.subr.mxu0 %v1294_v60 }
  0xc4   : > { %3324 = vrot.lane.b32.xlu1 %v9030_v2, %s8919_s8  ;;  %3152 = vrot.lane.b32.xlu0 %v9047_v5, %s8918_s29  ;;  %s8925_s29 = smov 56  }
  0xc5   : > { %v1283_v61 = vpop.permute.xlu1 %1282  ;;  %v1291_v62 = vpop.permute.xlu0 %1290 }
  0xc6   : > { %v1293_v63 = vsel %vm1292_vm6, %v1283_v61, %v1285_v55  ;;  %v1296_v6 = vsel %vm1292_vm6, %v1289_v58, %v1291_v62 }
  0xc7   : > { %1305 = vmatpush1.msra.mxu0 %v1293_v63  ;;  %1375 = vmatprep.subr.mxu1 %v1296_v6  ;;  %v7876_v63 = vld [vmem:[%s10228_s1 + $0x50] sm:$0xff] }
  0xc8   : > { %3328 = vrot.lane.b32.xlu1 %v9027_v1, %s8919_s8  ;;  %3326 = vrot.lane.b32.xlu0 %v9040_v4, %s8919_s8 }
  0xc9   : > { %1376 = vmatpush1.msra.mxu1 %v1295_v9  ;;  %v1457_v13 = vpop.permute.xlu1 %1456  ;;  %v1455_v14 = vpop.permute.xlu0 %1454  ;;  %7865 = vmatmul.mubr.msk.f32.vlgmr.msra.gmra.mrb[0].mxu0 %vm309_vm1, %v7864_v7 }
  0xca   : > { %v1464_v15 = vsel %vm1462_vm7, %v1455_v14, %v1457_v13  ;;  %7866 = vmatmul.mubr.msk.f32.vlgmr.msra.gmra.mrb[0].mxu1 %vm309_vm1, %v7864_v7  ;;  %1538 = vmatprep.mubr.f32.mxu0 %v8901_v0 }
  0xcb   : > { %1474 = vmatprep.subr.mxu0 %v1464_v15  ;;  %1609 = vmatprep.mubr.f32.mxu1 %v8901_v0 }
  0xcc   : > { %3322 = vrot.lane.b32.xlu1 %v9047_v5, %s8919_s8  ;;  %3330 = vrot.lane.b32.xlu0 %v9037_v3, %s8919_s8 }
  0xcd   : > { %v1461_v16 = vpop.permute.xlu1 %1460  ;;  %v1459_v17 = vpop.permute.xlu0 %1458 }
  0xce   : > { %v1466_v18 = vsel %vm1462_vm7, %v1459_v17, %v1461_v16  ;;  %v1465_v20 = vsel %vm1462_vm7, %v1457_v13, %v1459_v17  ;;  %v4432_v16 = vld [vmem:[%s10229_s2] sm:$0xff] }
  0xcf   : > { %1545 = vmatprep.subr.mxu1 %v1466_v18 }
  0xd0   : > { %3496 = vrot.lane.b32.xlu1 %v9040_v4, %s8920_s14  ;;  %3494 = vrot.lane.b32.xlu0 %v9030_v2, %s8920_s14 }
  0xd1   : > { %1546 = vmatpush1.msra.mxu1 %v1465_v20  ;;  %v1625_v24 = vpop.permute.xlu1 %1624  ;;  %v1453_v26 = vpop.permute.xlu0 %1452  ;;  %v7879_v20 = vld [vmem:[%s10228_s1 + $0x58] sm:$0xff] }
  0xd2   : > { %v1463_v27 = vsel %vm1462_vm7, %v1453_v26, %v1455_v14  ;;  %7869 = vmatmul.mubr.msk.f32.vlgmr.msra.gmra.mrb[0].mxu1 %vm309_vm1, %v7867_v21  ;;  %vm2992_vm7 = vcmask 252928  }
  0xd3   : > { %1475 = vmatpush1.msra.mxu0 %v1463_v27  ;;  %1779 = vmatprep.mubr.f32.mxu1 %v8901_v0 }
  0xd4   : > { %3500 = vrot.lane.b32.xlu1 %v9037_v3, %s8920_s14  ;;  %3498 = vrot.lane.b32.xlu0 %v9027_v1, %s8920_s14 }
  0xd5   : > { %v1629_v29 = vpop.permute.xlu1 %1628  ;;  %v1627_v31 = vpop.permute.xlu0 %1626  ;;  %7868 = vmatmul.mubr.msk.f32.vlgmr.msra.gmra.mrb[0].mxu0 %vm309_vm1, %v7867_v21  ;;  %v8921_v21 = vmov 0  }
  0xd6   : > { %v1634_v35 = vsel %vm1632_vm8, %v1625_v24, %v1627_v31  ;;  %1708 = vmatprep.mubr.f32.mxu0 %v8901_v0  ;;  %v1635_v43 = vsel %vm1632_vm8, %v1627_v31, %v1629_v29  ;;  %8835 = vset.pattern.permute.xlu1 %v8921_v21 }
  0xd7   : > { %1644 = vmatprep.subr.mxu0 %v1634_v35  ;;  %8836 = vset.pattern.permute.xlu0 %v8921_v21 }
  0xd8   : > { %3814 = vrot.lane.b32.xlu1 %v281_v34, %s8902_s18  ;;  %3492 = vrot.lane.b32.xlu0 %v9047_v5, %s8920_s14 }
  0xd9   : > { %v1623_v36 = vpop.permute.xlu1 %1622  ;;  %v1631_v37 = vpop.permute.xlu0 %1630 }
  0xda   : > { %v1633_v38 = vsel %vm1632_vm8, %v1623_v36, %v1625_v24  ;;  %v1636_v39 = vsel %vm1632_vm8, %v1629_v29, %v1631_v37  ;;  %vm3162_vm8 = vcmask 244736  }
  0xdb   : > { %1645 = vmatpush1.msra.mxu0 %v1633_v38  ;;  %1715 = vmatprep.subr.mxu1 %v1636_v39  ;;  %v7882_v39 = vld [vmem:[%s10228_s1 + $0x60] sm:$0xff] }
  0xdc   : > { %4124 = vrot.lane.b32.xlu1 %v281_v34, %s8904_s20  ;;  %3969 = vrot.lane.b32.xlu0 %v281_v34, %s8903_s19  ;;  %s8924_s20 = smov 58  }
  0xdd   : > { %1716 = vmatpush1.msra.mxu1 %v1635_v43  ;;  %v1797_v5 = vpop.permute.xlu1 %1796  ;;  %v1795_v45 = vpop.permute.xlu0 %1794  ;;  %7871 = vmatmul.mubr.msk.f32.vlgmr.msra.gmra.mrb[0].mxu0 %vm309_vm1, %v7870_v41 }
  0xde   : > { %v1804_v47 = vsel %vm1802_vm9, %v1795_v45, %v1797_v5  ;;  %7872 = vmatmul.mubr.msk.f32.vlgmr.msra.gmra.mrb[0].mxu1 %vm309_vm1, %v7870_v41  ;;  %1878 = vmatprep.mubr.f32.mxu0 %v8901_v0 }
  0xdf   : > { %1814 = vmatprep.subr.mxu0 %v1804_v47  ;;  %1949 = vmatprep.mubr.f32.mxu1 %v8901_v0 }
  0xe0   : > { %4279 = vrot.lane.b32.xlu0 %v281_v34, %s8905_s21  ;;  %4435 = vperm.xlu1 %8835, %v4432_v16  }
  0xe1   : > { %v1801_v48 = vpop.permute.xlu1 %1800  ;;  %v1799_v49 = vpop.permute.xlu0 %1798 }
  0xe2   : > { %v1806_v50 = vsel %vm1802_vm9, %v1799_v49, %v1801_v48  ;;  %v1805_v51 = vsel %vm1802_vm9, %v1797_v5, %v1799_v49 }
  0xe3   : > { %1885 = vmatprep.subr.mxu1 %v1806_v50 }
  0xe4   : > { %1886 = vmatpush1.msra.mxu1 %v1805_v51  ;;  %v7885_v51 = vld [vmem:[%s10228_s1 + $0x68] sm:$0xff] }
  0xe5   : > { %v1965_v53 = vpop.permute.xlu1 %1964  ;;  %v1793_v54 = vpop.permute.xlu0 %1792 }
  0xe6   : > { %v1803_v55 = vsel %vm1802_vm9, %v1793_v54, %v1795_v45  ;;  %7875 = vmatmul.mubr.msk.f32.vlgmr.msra.gmra.mrb[0].mxu1 %vm309_vm1, %v7873_v52  ;;  %vm3332_vm9 = vcmask 236544  }
  0xe7   : > { %1815 = vmatpush1.msra.mxu0 %v1803_v55  ;;  %2119 = vmatprep.mubr.f32.mxu1 %v8901_v0 }
  0xe8   : > { %7874 = vmatmul.mubr.msk.f32.vlgmr.msra.gmra.mrb[0].mxu0 %vm309_vm1, %v7873_v52 }
  0xe9   : > { %v1969_v56 = vpop.permute.xlu1 %1968  ;;  %v1967_v57 = vpop.permute.xlu0 %1966  ;;  %2048 = vmatprep.mubr.f32.mxu0 %v8901_v0 }
  0xea   : > { %v1974_v58 = vsel %vm1972_vm10, %v1965_v53, %v1967_v57  ;;  %v1975_v6 = vsel %vm1972_vm10, %v1967_v57, %v1969_v56 }
  0xeb   : > { %1984 = vmatprep.subr.mxu0 %v1974_v58 }
  0xed   : > { %v1963_v59 = vpop.permute.xlu1 %1962  ;;  %v1971_v60 = vpop.permute.xlu0 %1970 }
  0xee   : > { %v1973_v61 = vsel %vm1972_vm10, %v1963_v59, %v1965_v53  ;;  %v1976_v62 = vsel %vm1972_vm10, %v1969_v56, %v1971_v60 }
  0xef   : > { %1985 = vmatpush1.msra.mxu0 %v1973_v61  ;;  %2055 = vmatprep.subr.mxu1 %v1976_v62  ;;  %v7888_v62 = vld [vmem:[%s10228_s1 + $0x70] sm:$0xff] }
  0xf0   : > { %2056 = vmatpush1.msra.mxu1 %v1975_v6  ;;  %7877 = vmatmul.mubr.msk.f32.vlgmr.msra.gmra.mrb[0].mxu0 %vm309_vm1, %v7876_v63 }
  0xf1   : > { %v2137_v7 = vpop.permute.xlu1 %2136  ;;  %v2135_v9 = vpop.permute.xlu0 %2134  ;;  %7878 = vmatmul.mubr.msk.f32.vlgmr.msra.gmra.mrb[0].mxu1 %vm309_vm1, %v7876_v63  ;;  %2218 = vmatprep.mubr.f32.mxu0 %v8901_v0 }
  0xf2   : > { %v2144_v13 = vsel %vm2142_vm11, %v2135_v9, %v2137_v7  ;;  %2289 = vmatprep.mubr.f32.mxu1 %v8901_v0 }
  0xf3   : > { %2154 = vmatprep.subr.mxu0 %v2144_v13 }
  0xf5   : > { %v2141_v14 = vpop.permute.xlu1 %2140  ;;  %v2139_v15 = vpop.permute.xlu0 %2138 }
  0xf6   : > { %v2146_v17 = vsel %vm2142_vm11, %v2139_v15, %v2141_v14  ;;  %v2145_v18 = vsel %vm2142_vm11, %v2137_v7, %v2139_v15 }
  0xf7   : > { %2225 = vmatprep.subr.mxu1 %v2146_v17  ;;  %v7891_v17 = vld [vmem:[%s10228_s1 + $0x78] sm:$0xff] }
  0xf8   : > { %2226 = vmatpush1.msra.mxu1 %v2145_v18 }
  0xf9   : > { %v2305_v24 = vpop.permute.xlu1 %2304  ;;  %v2133_v26 = vpop.permute.xlu0 %2132  ;;  %7881 = vmatmul.mubr.msk.f32.vlgmr.msra.gmra.mrb[0].mxu1 %vm309_vm1, %v7879_v20 }
  0xfa   : > { %v2143_v27 = vsel %vm2142_vm11, %v2133_v26, %v2135_v9  ;;  %2459 = vmatprep.mubr.f32.mxu1 %v8901_v0  ;;  %vm3502_vm11 = vcmask 228352  }
  0xfb   : > { %2155 = vmatpush1.msra.mxu0 %v2143_v27 }
  0xfc   : > { %7880 = vmatmul.mubr.msk.f32.vlgmr.msra.gmra.mrb[0].mxu0 %vm309_vm1, %v7879_v20 }
  0xfd   : > { %v2309_v29 = vpop.permute.xlu1 %2308  ;;  %v2307_v31 = vpop.permute.xlu0 %2306  ;;  %2388 = vmatprep.mubr.f32.mxu0 %v8901_v0 }
  0xfe   : > { %v2314_v34 = vsel %vm2312_vm12, %v2305_v24, %v2307_v31  ;;  %v2315_v41 = vsel %vm2312_vm12, %v2307_v31, %v2309_v29 }
  0xff   : > { %2324 = vmatprep.subr.mxu0 %v2314_v34 }
 0x101   : > { %v2303_v35 = vpop.permute.xlu1 %2302  ;;  %v2311_v36 = vpop.permute.xlu0 %2310 }
 0x102   : > { %v2313_v37 = vsel %vm2312_vm12, %v2303_v35, %v2305_v24  ;;  %v2316_v38 = vsel %vm2312_vm12, %v2309_v29, %v2311_v36  ;;  %v7894_v36 = vld [vmem:[%s10228_s1 + $0x80] sm:$0xff] }
 0x103   : > { %2325 = vmatpush1.msra.mxu0 %v2313_v37  ;;  %2395 = vmatprep.subr.mxu1 %v2316_v38 }
 0x104   : > { %2396 = vmatpush1.msra.mxu1 %v2315_v41  ;;  %7883 = vmatmul.mubr.msk.f32.vlgmr.msra.gmra.mrb[0].mxu0 %vm309_vm1, %v7882_v39 }
 0x105   : > { %7884 = vmatmul.mubr.msk.f32.vlgmr.msra.gmra.mrb[0].mxu1 %vm309_vm1, %v7882_v39  ;;  %2558 = vmatprep.mubr.f32.mxu0 %v8901_v0 }
 0x106   : > { %v2477_v43 = vpop.permute.xlu1 %2476  ;;  %v2475_v5 = vpop.permute.xlu0 %2474  ;;  %2629 = vmatprep.mubr.f32.mxu1 %v8901_v0 }
 0x107   : > { %v2484_v45 = vsel %vm2482_vm13, %v2475_v5, %v2477_v43 }
 0x108   : > { %2494 = vmatprep.subr.mxu0 %v2484_v45 }
 0x10a   : > { %v2481_v47 = vpop.permute.xlu1 %2480  ;;  %v2479_v48 = vpop.permute.xlu0 %2478 }
 0x10b   : > { %v2485_v49 = vsel %vm2482_vm13, %v2477_v43, %v2479_v48  ;;  %v2486_v50 = vsel %vm2482_vm13, %v2479_v48, %v2481_v47  ;;  %v7897_v48 = vld [vmem:[%s10228_s1 + $0x88] sm:$0xff] }
 0x10c   : > { %2565 = vmatprep.subr.mxu1 %v2486_v50 }
 0x10d   : > { %2566 = vmatpush1.msra.mxu1 %v2485_v49 }
 0x10e   : > { %v2645_v52 = vpop.permute.xlu1 %2644  ;;  %v2473_v53 = vpop.permute.xlu0 %2472  ;;  %7887 = vmatmul.mubr.msk.f32.vlgmr.msra.gmra.mrb[0].mxu1 %vm309_vm1, %v7885_v51 }
 0x10f   : > { %v2483_v54 = vsel %vm2482_vm13, %v2473_v53, %v2475_v5  ;;  %2799 = vmatprep.mubr.f32.mxu1 %v8901_v0 }
 0x110   : > { %2495 = vmatpush1.msra.mxu0 %v2483_v54 }
 0x111   : > { %7886 = vmatmul.mubr.msk.f32.vlgmr.msra.gmra.mrb[0].mxu0 %vm309_vm1, %v7885_v51 }
 0x112   : > { %v2649_v55 = vpop.permute.xlu1 %2648  ;;  %v2647_v56 = vpop.permute.xlu0 %2646  ;;  %2728 = vmatprep.mubr.f32.mxu0 %v8901_v0 }
 0x113   : > { %v2654_v57 = vsel %vm2652_vm14, %v2645_v52, %v2647_v56  ;;  %v2655_v63 = vsel %vm2652_vm14, %v2647_v56, %v2649_v55 }
 0x114   : > { %2664 = vmatprep.subr.mxu0 %v2654_v57 }
 0x116   : > { %v2643_v58 = vpop.permute.xlu1 %2642  ;;  %v2651_v59 = vpop.permute.xlu0 %2650 }
 0x117   : > { %v2653_v60 = vsel %vm2652_vm14, %v2643_v58, %v2645_v52  ;;  %v2656_v61 = vsel %vm2652_vm14, %v2649_v55, %v2651_v59  ;;  %v7900_v59 = vld [vmem:[%s10228_s1 + $0x90] sm:$0xff] }
 0x118   : > { %2665 = vmatpush1.msra.mxu0 %v2653_v60  ;;  %2735 = vmatprep.subr.mxu1 %v2656_v61 }
 0x119   : > { %2736 = vmatpush1.msra.mxu1 %v2655_v63  ;;  %7889 = vmatmul.mubr.msk.f32.vlgmr.msra.gmra.mrb[0].mxu0 %vm309_vm1, %v7888_v62 }
 0x11a   : > { %v2817_v6 = vpop.permute.xlu1 %2816  ;;  %v2815_v7 = vpop.permute.xlu0 %2814  ;;  %7890 = vmatmul.mubr.msk.f32.vlgmr.msra.gmra.mrb[0].mxu1 %vm309_vm1, %v7888_v62  ;;  %2898 = vmatprep.mubr.f32.mxu0 %v8901_v0 }
 0x11b   : > { %v2824_v9 = vsel %vm2822_vm15, %v2815_v7, %v2817_v6  ;;  %2969 = vmatprep.mubr.f32.mxu1 %v8901_v0 }
 0x11c   : > { %2834 = vmatprep.subr.mxu0 %v2824_v9 }
 0x11e   : > { %v2821_v13 = vpop.permute.xlu1 %2820  ;;  %v2819_v14 = vpop.permute.xlu0 %2818 }
 0x11f   : > { %v2825_v15 = vsel %vm2822_vm15, %v2817_v6, %v2819_v14  ;;  %v2826_v16 = vsel %vm2822_vm15, %v2819_v14, %v2821_v13  ;;  %v7903_v14 = vld [vmem:[%s10228_s1 + $0x98] sm:$0xff] }
 0x120   : > { %2905 = vmatprep.subr.mxu1 %v2826_v16 }
 0x121   : > { %2906 = vmatpush1.msra.mxu1 %v2825_v15 }
 0x122   : > { %v2985_v18 = vpop.permute.xlu1 %2984  ;;  %v2813_v20 = vpop.permute.xlu0 %2812  ;;  %7893 = vmatmul.mubr.msk.f32.vlgmr.msra.gmra.mrb[0].mxu1 %vm309_vm1, %v7891_v17 }
 0x123   : > { %v2823_v21 = vsel %vm2822_vm15, %v2813_v20, %v2815_v7  ;;  %3139 = vmatprep.mubr.f32.mxu1 %v8901_v0 }
 0x124   : > { %2835 = vmatpush1.msra.mxu0 %v2823_v21 }
 0x125   : > { %7892 = vmatmul.mubr.msk.f32.vlgmr.msra.gmra.mrb[0].mxu0 %vm309_vm1, %v7891_v17 }
 0x126   : > { %v2989_v24 = vpop.permute.xlu1 %2988  ;;  %v2987_v26 = vpop.permute.xlu0 %2986  ;;  %3068 = vmatprep.mubr.f32.mxu0 %v8901_v0 }
 0x127   : > { %v2994_v27 = vsel %vm2992_vm7, %v2985_v18, %v2987_v26  ;;  %v2995_v37 = vsel %vm2992_vm7, %v2987_v26, %v2989_v24 }
 0x128   : > { %3004 = vmatprep.subr.mxu0 %v2994_v27  ;;  %v7997_v27 = vld [vmem:[%s10230_s3 + $0x140] sm:$0xff] }
 0x12a   : > { %v2983_v29 = vpop.permute.xlu1 %2982  ;;  %v2991_v31 = vpop.permute.xlu0 %2990 }
 0x12b   : > { %v2993_v34 = vsel %vm2992_vm7, %v2983_v29, %v2985_v18  ;;  %v2996_v35 = vsel %vm2992_vm7, %v2989_v24, %v2991_v31 }
 0x12c   : > { %3005 = vmatpush1.msra.mxu0 %v2993_v34  ;;  %3075 = vmatprep.subr.mxu1 %v2996_v35 }
 0x12d   : > { %3076 = vmatpush1.msra.mxu1 %v2995_v37  ;;  %7895 = vmatmul.mubr.msk.f32.vlgmr.msra.gmra.mrb[0].mxu0 %vm309_vm1, %v7894_v36 }
 0x12e   : > { %v3157_v38 = vpop.permute.xlu1 %3156  ;;  %v3155_v39 = vpop.permute.xlu0 %3154  ;;  %7896 = vmatmul.mubr.msk.f32.vlgmr.msra.gmra.mrb[0].mxu1 %vm309_vm1, %v7894_v36  ;;  %3238 = vmatprep.mubr.f32.mxu0 %v8901_v0 }
 0x12f   : > { %v3164_v41 = vsel %vm3162_vm8, %v3155_v39, %v3157_v38  ;;  %3309 = vmatprep.mubr.f32.mxu1 %v8901_v0 }
 0x130   : > { %3174 = vmatprep.subr.mxu0 %v3164_v41 }
 0x132   : > { %v3161_v43 = vpop.permute.xlu1 %3160  ;;  %v3159_v5 = vpop.permute.xlu0 %3158 }
 0x133   : > { %v3165_v45 = vsel %vm3162_vm8, %v3157_v38, %v3159_v5  ;;  %v3166_v47 = vsel %vm3162_vm8, %v3159_v5, %v3161_v43 }
 0x134   : > { %3245 = vmatprep.subr.mxu1 %v3166_v47 }
 0x135   : > { %3246 = vmatpush1.msra.mxu1 %v3165_v45 }
 0x136   : > { %v3325_v49 = vpop.permute.xlu1 %3324  ;;  %v3153_v50 = vpop.permute.xlu0 %3152  ;;  %7899 = vmatmul.mubr.msk.f32.vlgmr.msra.gmra.mrb[0].mxu1 %vm309_vm1, %v7897_v48 }
 0x137   : > { %v3163_v51 = vsel %vm3162_vm8, %v3153_v50, %v3155_v39  ;;  %3479 = vmatprep.mubr.f32.mxu1 %v8901_v0 }
 0x138   : > { %3175 = vmatpush1.msra.mxu0 %v3163_v51 }
 0x139   : > { %7898 = vmatmul.mubr.msk.f32.vlgmr.msra.gmra.mrb[0].mxu0 %vm309_vm1, %v7897_v48 }
 0x13a   : > { %v3329_v52 = vpop.permute.xlu1 %3328  ;;  %v3327_v53 = vpop.permute.xlu0 %3326  ;;  %3408 = vmatprep.mubr.f32.mxu0 %v8901_v0 }
 0x13b   : > { %v3334_v54 = vsel %vm3332_vm9, %v3325_v49, %v3327_v53  ;;  %v3335_v60 = vsel %vm3332_vm9, %v3327_v53, %v3329_v52 }
 0x13c   : > { %3344 = vmatprep.subr.mxu0 %v3334_v54 }
 0x13e   : > { %v3323_v55 = vpop.permute.xlu1 %3322  ;;  %v3331_v56 = vpop.permute.xlu0 %3330 }
 0x13f   : > { %v3333_v57 = vsel %vm3332_vm9, %v3323_v55, %v3325_v49  ;;  %v3336_v58 = vsel %vm3332_vm9, %v3329_v52, %v3331_v56  ;;  %v7998_v52 = vld [vmem:[%s10230_s3 + $0x148] sm:$0xff]  ;;  %v7999_v55 = vld [vmem:[%s10230_s3 + $0x150] sm:$0xff] }
 0x140   : > { %3345 = vmatpush1.msra.mxu0 %v3333_v57  ;;  %3415 = vmatprep.subr.mxu1 %v3336_v58 }
 0x141   : > { %3416 = vmatpush1.msra.mxu1 %v3335_v60  ;;  %7901 = vmatmul.mubr.msk.f32.vlgmr.msra.gmra.mrb[0].mxu0 %vm309_vm1, %v7900_v59 }
 0x142   : > { %v3497_v61 = vpop.permute.xlu1 %3496  ;;  %7902 = vmatmul.mubr.msk.f32.vlgmr.msra.gmra.mrb[0].mxu1 %vm309_vm1, %v7900_v59  ;;  %v3495_v62 = vpop.permute.xlu0 %3494  ;;  %3578 = vmatprep.mubr.f32.mxu0 %v8901_v0  ;;  %v8000_v59 = vld [vmem:[%s10230_s3 + $0x158] sm:$0xff] }
 0x143   : > { %v3504_v63 = vsel %vm3502_vm11, %v3495_v62, %v3497_v61  ;;  %3649 = vmatprep.mubr.f32.mxu1 %v8901_v0 }
 0x144   : > { %3514 = vmatprep.subr.mxu0 %v3504_v63  ;;  %v7921_v63 = vld [vmem:[%s10230_s3 + $0x20] sm:$0xff] }
 0x146   : > { %v3501_v6 = vpop.permute.xlu1 %3500  ;;  %v3499_v7 = vpop.permute.xlu0 %3498 }
 0x147   : > { %v3505_v9 = vsel %vm3502_vm11, %v3497_v61, %v3499_v7  ;;  %v3506_v13 = vsel %vm3502_vm11, %v3499_v7, %v3501_v6  ;;  %v8005_v61 = vld [vmem:[%s10230_s3 + $0x160] sm:$0xff] }
 0x148   : > { %3585 = vmatprep.subr.mxu1 %v3506_v13 }
 0x149   : > { %3586 = vmatpush1.msra.mxu1 %v3505_v9 }
 0x14a   : > { %v3815_v15 = vpop.permute.xlu1 %3814  ;;  %7905 = vmatmul.mubr.msk.f32.vlgmr.msra.gmra.mrb[0].mxu1 %vm309_vm1, %v7903_v14  ;;  %3736 = vmatprep.subr.mxu1 %v9037_v3  ;;  %v3493_v16 = vpop.permute.xlu0 %3492 }
 0x14b   : > { %v3503_v17 = vsel %vm3502_vm11, %v3493_v16, %v3495_v62  ;;  %3737 = vmatpush1.msra.mxu1 %v9027_v1  ;;  %v3816_v18 = vsel %vm300_vm0, %v9141_v8, %v3815_v15  ;;  %3800 = vmatprep.mubr.f32.mxu1 %v8901_v0  ;;  %v7906_v1 = vld [vmem:[%s10228_s1 + $0xa0] sm:$0xff] }
 0x14c   : > { %3515 = vmatpush1.msra.mxu0 %v3503_v17  ;;  %3892 = vmatprep.subr.mxu1 %v3816_v18 }
 0x14d   : > { %7904 = vmatmul.mubr.msk.f32.vlgmr.msra.gmra.mrb[0].mxu0 %vm309_vm1, %v7903_v14  ;;  %3665 = vmatprep.subr.mxu0 %v9040_v4 }
 0x14e   : > { %3666 = vmatpush1.msra.mxu0 %v9030_v2  ;;  %3729 = vmatprep.mubr.f32.mxu0 %v8901_v0  ;;  %v3970_v3 = vpop.permute.xlu0 %3969  ;;  %v7909_v2 = vld [vmem:[%s10228_s1 + $0xa8] sm:$0xff]  ;;  %v4125_v4 = vpop.permute.xlu1 %4124 }
 0x14f   : > { %3821 = vmatprep.subr.mxu0 %v9151_v12  ;;  %v3971_v8 = vsel %vm612_vm2, %v9182_v22, %v3970_v3  ;;  %v7264_v3 = vld [vmem:[%s10231_s4 + $0x10] sm:$0xff] }
 0x152   : > { %7908 = vmatmul.mubr.msk.f32.vlgmr.msra.gmra.mrb[0].mxu1 %vm309_vm1, %v7906_v1  ;;  %v4280_v12 = vpop.permute.xlu0 %4279 }
 0x153   : > { %3893 = vmatpush1.msra.mxu1 %v9148_v11  ;;  %3956 = vmatprep.mubr.f32.mxu1 %v8901_v0  ;;  %v4126_v11 = vsel %vm782_vm3, %v9213_v30, %v4125_v4  ;;  %v4281_v22 = vsel %vm952_vm4, %v9244_v42, %v4280_v12  ;;  %vm4952_vm3 = vcmask 982016  }
 0x154   : > { %4047 = vmatprep.subr.mxu1 %v3971_v8  ;;  %v7265_v8 = vld [vmem:[%s10231_s4 + $0x18] sm:$0xff] }
 0x155   : > { %7907 = vmatmul.mubr.msk.f32.vlgmr.msra.gmra.mrb[0].mxu0 %vm309_vm1, %v7906_v1  ;;  %v7262_v1 = vld [vmem:[%s10231_s4] sm:$0xff] }
 0x156   : > { %3822 = vmatpush1.msra.mxu0 %v9144_v10  ;;  %3885 = vmatprep.mubr.f32.mxu0 %v8901_v0  ;;  %v7912_v10 = vld [vmem:[%s10228_s1 + $0xb0] sm:$0xff] }
 0x157   : > { %3976 = vmatprep.subr.mxu0 %v9197_v25 }
 0x15a   : > { %7911 = vmatmul.mubr.msk.f32.vlgmr.msra.gmra.mrb[0].mxu1 %vm309_vm1, %v7909_v2 }
 0x15b   : > { %4048 = vmatpush1.msra.mxu1 %v9186_v23  ;;  %4111 = vmatprep.mubr.f32.mxu1 %v8901_v0  ;;  %v7918_v23 = vld [vmem:[%s10228_s1 + $0xc0] sm:$0xff] }
 0x15c   : > { %4202 = vmatprep.subr.mxu1 %v4126_v11 }
 0x15d   : > { %7910 = vmatmul.mubr.msk.f32.vlgmr.msra.gmra.mrb[0].mxu0 %vm309_vm1, %v7909_v2  ;;  %v7263_v2 = vld [vmem:[%s10231_s4 + $0x8] sm:$0xff] }
 0x15e   : > { %3977 = vmatpush1.msra.mxu0 %v9171_v19  ;;  %4040 = vmatprep.mubr.f32.mxu0 %v8901_v0  ;;  %v7915_v19 = vld [vmem:[%s10228_s1 + $0xb8] sm:$0xff] }
 0x15f   : > { %4131 = vmatprep.subr.mxu0 %v9221_v33  ;;  %v4436_v25 = vpop.permute.xlu1 %4435 }
 0x162   : > { %7914 = vmatmul.mubr.msk.f32.vlgmr.msra.gmra.mrb[0].mxu1 %vm309_vm1, %v7912_v10 }
 0x163   : > { %4203 = vmatpush1.msra.mxu1 %v9217_v32  ;;  %4266 = vmatprep.mubr.f32.mxu1 %v8901_v0 }
 0x164   : > { %4357 = vmatprep.subr.mxu1 %v4281_v22  ;;  %v8006_v22 = vld [vmem:[%s10230_s3 + $0x168] sm:$0xff] }
 0x165   : > { %7913 = vmatmul.mubr.msk.f32.vlgmr.msra.gmra.mrb[0].mxu0 %vm309_vm1, %v7912_v10 }
 0x166   : > { %4132 = vmatpush1.msra.mxu0 %v9202_v28  ;;  %4195 = vmatprep.mubr.f32.mxu0 %v8901_v0 }
 0x167   : > { %4286 = vmatprep.subr.mxu0 %v9260_v46 }
 0x16a   : > { %7917 = vmatmul.mubr.msk.f32.vlgmr.msra.gmra.mrb[0].mxu1 %vm309_vm1, %v7915_v19 }
 0x16b   : > { %4358 = vmatpush1.msra.mxu1 %v9250_v44  ;;  %4421 = vmatprep.mubr.f32.mxu1 %v8901_v0 }
 0x16d   : > { %7916 = vmatmul.mubr.msk.f32.vlgmr.msra.gmra.mrb[0].mxu0 %vm309_vm1, %v7915_v19  ;;  %v8007_v19 = vld [vmem:[%s10230_s3 + $0x170] sm:$0xff] }
 0x16e   : > { %4287 = vmatpush1.msra.mxu0 %v9237_v40  ;;  %4350 = vmatprep.mubr.f32.mxu0 %v8901_v0 }
 0x172   : > { %7920 = vmatmul.mubr.msk.f32.vlgmr.msra.gmra.mrb[0].mxu1 %vm309_vm1, %v7918_v23 }
 0x173   : > { %8293 = vmatprep.mubr.msk.f32.mxu1 %vm309_vm1, %v7921_v63 }
 0x175   : > { %7919 = vmatmul.mubr.msk.f32.vlgmr.msra.gmra.mrb[0].mxu0 %vm309_vm1, %v7918_v23 }
 0x176   : > { %8373 = vmatprep.mubr.msk.f32.mxu0 %vm309_vm1, %v7997_v27  ;;  %v7922_v27 = vld [vmem:[%s10230_s3 + $0x28] sm:$0xff] }
 0x245   : > { %v4423_v28 = vpop.f32.mrb[0].mxu1 }
 0x246   : > { %v4440_v30 = vadd.f32 %v4436_v25, %v4423_v28  ;;  %v4425_v32 = vpop.f32.mrb[1].mxu1 }
 0x247   : > { %v4441_v40 = vadd.f32 %v4436_v25, %v4425_v32  ;;  %v8013_v32 = vld [vmem:[%s10230_s3 + $0x180] sm:$0xff] }
 0x248   : > { %v4444_v33 = vmax.f32 %v4440_v30, 0.0  ;;  %v4352_v42 = vpop.f32.mrb[0].mxu0  ;;  %v8008_v30 = vld [vmem:[%s10230_s3 + $0x178] sm:$0xff] }
 0x249   : > { %v4354_v44 = vpop.f32.mrb[1].mxu0  ;;  %v9510_v21 = vmax.f32 %v4441_v40, 0.0  ;;  %v4438_v24 = vadd.f32 %v4436_v25, %v4352_v42  ;;  %v8015_v40 = vld [vmem:[%s10230_s3 + $0x190] sm:$0xff] }
 0x24a   : > { %v4439_v46 = vadd.f32 %v4436_v25, %v4354_v44  ;;  %4473 = vrot.lane.b32.xlu0 %v4444_v33, %s8906_s22  ;;  %4454 = vrot.lane.b32.xlu1 %v4444_v33, %s8902_s18 }
 0x24b   : > { %v4442_v26 = vmax.f32 %v4438_v24, 0.0 }
 0x24c   : > { %v4443_v20 = vmax.f32 %v4439_v46, 0.0  ;;  %v8014_v46 = vld [vmem:[%s10230_s3 + $0x188] sm:$0xff] }
 0x24e   : > { %4452 = vrot.lane.b32.xlu0 %v4443_v20, %s8902_s18  ;;  %4471 = vrot.lane.b32.xlu1 %v4443_v20, %s8906_s22 }
 0x252   : > { %4475 = vrot.lane.b32.xlu1 %v9510_v21, %s8906_s22  ;;  %4456 = vrot.lane.b32.xlu0 %v9510_v21, %s8902_s18 }
 0x256   : > { %4492 = vrot.lane.b32.xlu1 %v4444_v33, %s8907_s23  ;;  %4490 = vrot.lane.b32.xlu0 %v4443_v20, %s8907_s23 }
 0x25a   : > { %4450 = vrot.lane.b32.xlu1 %v4442_v26, %s8902_s18  ;;  %4494 = vrot.lane.b32.xlu0 %v9510_v21, %s8907_s23 }
 0x25e   : > { %4488 = vrot.lane.b32.xlu1 %v4442_v26, %s8907_s23  ;;  %4469 = vrot.lane.b32.xlu0 %v4442_v26, %s8906_s22  ;;  %s8922_s22 = smov 122   ;;  %s8923_s23 = smov 120  }
 0x2bc   : > { %v4474_v29 = vpop.permute.xlu0 %4473  ;;  %v4455_v31 = vpop.permute.xlu1 %4454 }
 0x2c0   : > { %v4453_v34 = vpop.permute.xlu0 %4452  ;;  %v4472_v35 = vpop.permute.xlu1 %4471 }
 0x2c1   : > { %v4459_v36 = vsel %vm300_vm0, %v4453_v34, %v4455_v31  ;;  %v4478_v43 = vsel %vm1122_vm5, %v4472_v35, %v4474_v29 }
 0x2c2   : > { %v4466_v37 = vmax.f32 %v4443_v20, %v4459_v36 }
 0x2c4   : > { %v4476_v38 = vpop.permute.xlu1 %4475  ;;  %v4457_v39 = vpop.permute.xlu0 %4456  ;;  %v4485_v5 = vmax.f32 %v4466_v37, %v4478_v43  ;;  %v7924_v37 = vld [vmem:[%s10230_s3 + $0x38] sm:$0xff] }
 0x2c5   : > { %v4460_v41 = vsel %vm300_vm0, %v4455_v31, %v4457_v39  ;;  %v4479_v51 = vsel %vm1122_vm5, %v4474_v29, %v4476_v38  ;;  %v4468_v16 = vmax.f32 %v9510_v21, %v4457_v39  ;;  %v8016_v29 = vld [vmem:[%s10230_s3 + $0x198] sm:$0xff]  ;;  %v7923_v31 = vld [vmem:[%s10230_s3 + $0x30] sm:$0xff]  ;;  %v4507_v39 = vld [vmem:[%s10230_s3] sm:$0xff] }
 0x2c6   : > { %v4467_v45 = vmax.f32 %v4444_v33, %v4460_v41  ;;  %v8023_v41 = vld [vmem:[%s10230_s3 + $0x1b0] sm:$0xff] }
 0x2c7   : > { %v4487_v17 = vmax.f32 %v4468_v16, %v4476_v38  ;;  %v8022_v38 = vld [vmem:[%s10230_s3 + $0x1a8] sm:$0xff] }
 0x2c8   : > { %v4493_v47 = vpop.permute.xlu1 %4492  ;;  %v4491_v48 = vpop.permute.xlu0 %4490  ;;  %v4486_v53 = vmax.f32 %v4467_v45, %v4479_v51  ;;  %v4508_v45 = vld [vmem:[%s10230_s3 + $0x8] sm:$0xff] }
 0x2c9   : > { %v4497_v49 = vsel %vm1292_vm6, %v4491_v48, %v4493_v47  ;;  %v8038_v16 = vld [vmem:[%s10230_s3 + $0x1e8] sm:$0xff] }
 0x2ca   : > { %v4504_v50 = vmax.f32 %v4485_v5, %v4497_v49  ;;  %v4509_v49 = vld [vmem:[%s10230_s3 + $0x10] sm:$0xff] }
 0x2cc   : > { %4520 = vrot.lane.b32.xlu0 %v4504_v50, %s8903_s19  ;;  %8371 = vmatprep.subr.mxu0 %v4504_v50  ;;  %v4495_v54 = vpop.permute.xlu0 %4494  ;;  %v4451_v57 = vpop.permute.xlu1 %4450 }
 0x2cd   : > { %v4498_v56 = vsel %vm1292_vm6, %v4493_v47, %v4495_v54  ;;  %8372 = vmatpush3.msra.mxu0 %v4504_v50  ;;  %v4458_v62 = vsel %vm300_vm0, %v4451_v57, %v4453_v34  ;;  %v4506_v18 = vmax.f32 %v4487_v17, %v4495_v54  ;;  %vm4839_vm0 = vcmask 998400   ;;  %v8021_v34 = vld [vmem:[%s10230_s3 + $0x1a0] sm:$0xff]  ;;  %v4510_v54 = vld [vmem:[%s10230_s3 + $0x18] sm:$0xff] }
 0x2ce   : > { %v9540_v58 = vmax.f32 %v4486_v53, %v4498_v56  ;;  %8374 = vmatmul.mubr.msk.f32.vlgmr.msra.gmra.mrb[2].mxu0 %vm309_vm1, %v7998_v52  ;;  %v4465_v7 = vmax.f32 %v4442_v26, %v4458_v62  ;;  %v7933_v56 = vld [vmem:[%s10230_s3 + $0x40] sm:$0xff]  ;;  %v7934_v62 = vld [vmem:[%s10230_s3 + $0x48] sm:$0xff] }
 0x2cf   : > { %8376 = vmatprep.mubr.msk.f32.mxu0 %vm309_vm1, %v7999_v55  ;;  %v8030_v55 = vld [vmem:[%s10230_s3 + $0x1c8] sm:$0xff]  ;;  %v7941_v17 = vld [vmem:[%s10230_s3 + $0x60] sm:$0xff] }
 0x2d0   : > { %4725 = vrot.lane.b32.xlu0 %v4504_v50, %s8905_s21  ;;  %5730 = vrot.lane.b32.xlu1 %v9540_v58, %s8903_s19  ;;  %v4470_v60 = vpop.permute.xlu0 %4469  ;;  %v4489_v9 = vpop.permute.xlu1 %4488 }
 0x2d1   : > { %v4477_v6 = vsel %vm1122_vm5, %v4470_v60, %v4472_v35  ;;  %v4496_v14 = vsel %vm1292_vm6, %v4489_v9, %v4491_v48  ;;  %v8024_v48 = vld [vmem:[%s10230_s3 + $0x1b8] sm:$0xff]  ;;  %v8031_v60 = vld [vmem:[%s10230_s3 + $0x1d0] sm:$0xff]  ;;  %v8037_v9 = vld [vmem:[%s10230_s3 + $0x1e0] sm:$0xff]  ;;  %vm5401_vm5 = vcmask 474112   ;;  %vm5514_vm6 = vcmask 457728  }
 0x2d2   : > { %8377 = vmatmul.mubr.msk.f32.gmra.mrb[4].mxu0 %vm309_vm1, %v8000_v59  ;;  %v4484_v13 = vmax.f32 %v4465_v7, %v4477_v6  ;;  %v8032_v6 = vld [vmem:[%s10230_s3 + $0x1d8] sm:$0xff]  ;;  %v7935_v7 = vld [vmem:[%s10230_s3 + $0x50] sm:$0xff] }
 0x2d3   : > { %8381 = vmatprep.mubr.msk.f32.mxu0 %vm309_vm1, %v8005_v61 }
 0x2d4   : > { %4837 = vrot.lane.b32.xlu0 %v4504_v50, %s8922_s22  ;;  %5840 = vrot.lane.b32.xlu1 %v9540_v58, %s8905_s21  ;;  %v9568_v15 = vmax.f32 %v4484_v13, %v4496_v14 }
 0x2d8   : > { %4950 = vrot.lane.b32.xlu0 %v4504_v50, %s8923_s23  ;;  %5950 = vrot.lane.b32.xlu1 %v9540_v58, %s8922_s22 }
 0x2dc   : > { %6060 = vrot.lane.b32.xlu1 %v9540_v58, %s8923_s23  ;;  %4518 = vrot.lane.b32.xlu0 %v9568_v15, %s8903_s19 }
 0x2e0   : > { %5063 = vrot.lane.b32.xlu1 %v4504_v50, %s8911_s13  ;;  %6170 = vrot.lane.b32.xlu0 %v9540_v58, %s8911_s13 }
 0x2e4   : > { %5175 = vrot.lane.b32.xlu1 %v4504_v50, %s8913_s15  ;;  %6280 = vrot.lane.b32.xlu0 %v9540_v58, %s8913_s15 }
 0x2e8   : > { %4723 = vrot.lane.b32.xlu1 %v9568_v15, %s8905_s21  ;;  %5287 = vrot.lane.b32.xlu0 %v4504_v50, %s8915_s16 }
 0x2ec   : > { %6390 = vrot.lane.b32.xlu1 %v9540_v58, %s8915_s16  ;;  %4835 = vrot.lane.b32.xlu0 %v9568_v15, %s8922_s22 }
 0x2f0   : > { %5399 = vrot.lane.b32.xlu1 %v4504_v50, %s8924_s20  ;;  %6500 = vrot.lane.b32.xlu0 %v9540_v58, %s8924_s20 }
 0x2f4   : > { %4948 = vrot.lane.b32.xlu1 %v9568_v15, %s8923_s23  ;;  %5512 = vrot.lane.b32.xlu0 %v4504_v50, %s8925_s29  ;;  %v8029_v50 = vld [vmem:[%s10230_s3 + $0x1c0] sm:$0xff] }
 0x2f8   : > { %6610 = vrot.lane.b32.xlu1 %v9540_v58, %s8925_s29  ;;  %5061 = vrot.lane.b32.xlu0 %v9568_v15, %s8911_s13 }
 0x2fc   : > { %5173 = vrot.lane.b32.xlu1 %v9568_v15, %s8913_s15  ;;  %6827 = vrot.lane.b32.xlu0 %v4506_v18, %s8903_s19 }
 0x300   : > { %5285 = vrot.lane.b32.xlu1 %v9568_v15, %s8915_s16  ;;  %6937 = vrot.lane.b32.xlu0 %v4506_v18, %s8905_s21 }
 0x304   : > { %5397 = vrot.lane.b32.xlu1 %v9568_v15, %s8924_s20  ;;  %7047 = vrot.lane.b32.xlu0 %v4506_v18, %s8922_s22  ;;  %s269_s22 = sand.u32 1, %s8891_s25  }
 0x305   : > { %s270_s9 = scalar_lea.vmem [#allocation2], %s269_s22  ;;  %s7775_s21 = scalar_lea.sflag [#allocation3], %s269_s22 }
 0x306   : > { %s7787_s14 = sshll.u32 %s270_s9, 4  ;;  %s10187_s14 = int_to_ptr.vmem [resolvable:$true] %s7787_s14 }
 0x308   : > { %5510 = vrot.lane.b32.xlu1 %v9568_v15, %s8925_s29  ;;  %7157 = vrot.lane.b32.xlu0 %v4506_v18, %s8923_s23  ;;  %s8138_s29 = sshll.u32 %s8990_s28, 4  ;;  %s8928_s28 = smov [#allocation2]  }
 0x309   : > { %s10185_s16 = scalar_lea.hbm %s10234_s7, %s8138_s29 }
 0x30c   : > { %7268 = vperm.xlu1 %8835, %v7262_v1   ;;  %7273 = vperm.xlu0 %8836, %v7263_v2   ;;  %v7942_v2 = vld [vmem:[%s10230_s3 + $0x68] sm:$0xff] }
 0x310   : > { %7278 = vperm.xlu1 %8835, %v7264_v3   ;;  %v8039_v3 = vld [vmem:[%s10230_s3 + $0x1f0] sm:$0xff] }
 0x314   : > { %7283 = vperm.xlu1 %8835, %v7265_v8  }
 0x33e   : > { %v4521_v4 = vpop.permute.xlu0 %4520 }
 0x342   : > { %v9616_v11 = vpop.permute.xlu1 %5730  ;;  %v9618_v10 = vpop.permute.xlu0 %4725 }
 0x343   : > { %v5732_v12 = vsel %vm612_vm2, %v4521_v4, %v9616_v11 }
 0x344   : > { %8379 = vmatprep.subr.mxu0 %v5732_v12 }
 0x345   : > { %8380 = vmatpush3.msra.mxu0 %v5732_v12  ;;  %v7943_v12 = vld [vmem:[%s10230_s3 + $0x70] sm:$0xff] }
 0x346   : > { %v9628_v23 = vpop.permute.xlu1 %5840  ;;  %8382 = vmatmul.mubr.msk.f32.vlgmr.msra.gmra.mrb[2].mxu0 %vm309_vm1, %v8006_v22  ;;  %v9631_v25 = vpop.permute.xlu0 %4837 }
 0x347   : > { %v5842_v28 = vsel %vm952_vm4, %v9618_v10, %v9628_v23  ;;  %8384 = vmatprep.mubr.msk.f32.mxu0 %vm309_vm1, %v8007_v19 }
 0x348   : > { %8387 = vmatprep.subr.mxu0 %v5842_v28 }
 0x349   : > { %8388 = vmatpush3.msra.mxu0 %v5842_v28 }
 0x34a   : > { %v9643_v33 = vpop.permute.xlu1 %5950  ;;  %8385 = vmatmul.mubr.msk.f32.gmra.mrb[4].mxu0 %vm309_vm1, %v8008_v30  ;;  %v9646_v42 = vpop.permute.xlu0 %4950  ;;  %v7944_v30 = vld [vmem:[%s10230_s3 + $0x78] sm:$0xff] }
 0x34b   : > { %v5952_v44 = vsel %vm4839_vm0, %v9631_v25, %v9643_v33  ;;  %8389 = vmatprep.mubr.msk.f32.mxu0 %vm309_vm1, %v8013_v32  ;;  %v8046_v32 = vld [vmem:[%s10230_s3 + $0x208] sm:$0xff] }
 0x34c   : > { %8395 = vmatprep.subr.mxu0 %v5952_v44 }
 0x34e   : > { %v9658_v20 = vpop.permute.xlu1 %6060  ;;  %8390 = vmatmul.mubr.msk.f32.vlgmr.msra.gmra.mrb[2].mxu0 %vm309_vm1, %v8014_v46  ;;  %v4519_v21 = vpop.permute.xlu0 %4518 }
 0x34f   : > { %8396 = vmatpush3.msra.mxu0 %v5952_v44  ;;  %v4522_v24 = vsel %vm612_vm2, %v4519_v21, %v4521_v4  ;;  %v6062_v26 = vsel %vm4952_vm3, %v9646_v42, %v9658_v20  ;;  %8392 = vmatprep.mubr.msk.f32.mxu0 %vm309_vm1, %v8015_v40  ;;  %v8047_v44 = vld [vmem:[%s10230_s3 + $0x210] sm:$0xff]  ;;  %v7950_v40 = vld [vmem:[%s10230_s3 + $0x88] sm:$0xff] }
 0x350   : > { %8291 = vmatprep.subr.mxu1 %v4522_v24  ;;  %8403 = vmatprep.subr.mxu0 %v6062_v26 }
 0x351   : > { %8292 = vmatpush3.msra.mxu1 %v4522_v24 }
 0x352   : > { %v9678_v35 = vpop.permute.xlu1 %5063  ;;  %8294 = vmatmul.mubr.msk.f32.vlgmr.msra.gmra.mrb[2].mxu1 %vm309_vm1, %v7922_v27  ;;  %8299 = vmatprep.subr.mxu1 %v9568_v15  ;;  %v6171_v36 = vpop.permute.xlu0 %6170  ;;  %v7951_v27 = vld [vmem:[%s10230_s3 + $0x90] sm:$0xff] }
 0x353   : > { %8393 = vmatmul.mubr.msk.f32.gmra.mrb[4].mxu0 %vm309_vm1, %v8016_v29  ;;  %8300 = vmatpush3.msra.mxu1 %v9568_v15  ;;  %v6172_v47 = vsel %vm1972_vm10, %v9678_v35, %v6171_v36  ;;  %v7936_v15 = vld [vmem:[%s10230_s3 + $0x58] sm:$0xff]  ;;  %v8054_v36 = vld [vmem:[%s10230_s3 + $0x228] sm:$0xff] }
 0x354   : > { %8296 = vmatprep.mubr.msk.f32.mxu1 %vm309_vm1, %v7923_v31  ;;  %8397 = vmatprep.mubr.msk.f32.mxu0 %vm309_vm1, %v8021_v34  ;;  %v8053_v31 = vld [vmem:[%s10230_s3 + $0x220] sm:$0xff] }
 0x356   : > { %v9698_v43 = vpop.permute.xlu1 %5175  ;;  %8297 = vmatmul.mubr.msk.f32.gmra.mrb[4].mxu1 %vm309_vm1, %v7924_v37  ;;  %v6281_v5 = vpop.permute.xlu0 %6280  ;;  %v7957_v37 = vld [vmem:[%s10230_s3 + $0xa0] sm:$0xff] }
 0x357   : > { %8398 = vmatmul.mubr.msk.f32.vlgmr.msra.gmra.mrb[2].mxu0 %vm309_vm1, %v8022_v38  ;;  %8301 = vmatprep.mubr.msk.f32.mxu1 %vm309_vm1, %v4507_v39  ;;  %v6282_v63 = vsel %vm2312_vm12, %v9698_v43, %v6281_v5  ;;  %v8055_v38 = vld [vmem:[%s10230_s3 + $0x230] sm:$0xff] }
 0x358   : > { %8404 = vmatpush3.msra.mxu0 %v6062_v26  ;;  %8400 = vmatprep.mubr.msk.f32.mxu0 %vm309_vm1, %v8023_v41  ;;  %v8048_v26 = vld [vmem:[%s10230_s3 + $0x218] sm:$0xff]  ;;  %v7958_v41 = vld [vmem:[%s10230_s3 + $0xa8] sm:$0xff] }
 0x359   : > { %8411 = vmatprep.subr.mxu0 %v6172_v47 }
 0x35a   : > { %v4724_v51 = vpop.permute.xlu1 %4723  ;;  %8302 = vmatmul.mubr.msk.f32.vlgmr.msra.gmra.mrb[2].mxu1 %vm309_vm1, %v4508_v45  ;;  %v9719_v52 = vpop.permute.xlu0 %5287 }
 0x35b   : > { %8401 = vmatmul.mubr.msk.f32.gmra.mrb[4].mxu0 %vm309_vm1, %v8024_v48  ;;  %v4727_v53 = vsel %vm952_vm4, %v4724_v51, %v9618_v10  ;;  %8304 = vmatprep.mubr.msk.f32.mxu1 %vm309_vm1, %v4509_v49  ;;  %v8040_v10 = vld [vmem:[%s10230_s3 + $0x1f8] sm:$0xff]  ;;  %v7959_v48 = vld [vmem:[%s10230_s3 + $0xb0] sm:$0xff]  ;;  %v8061_v49 = vld [vmem:[%s10230_s3 + $0x240] sm:$0xff] }
 0x35c   : > { %8307 = vmatprep.subr.mxu1 %v4727_v53  ;;  %8405 = vmatprep.mubr.msk.f32.mxu0 %vm309_vm1, %v8029_v50  ;;  %v7960_v51 = vld [vmem:[%s10230_s3 + $0xb8] sm:$0xff] }
 0x35d   : > { %8308 = vmatpush3.msra.mxu1 %v4727_v53 }
 0x35e   : > { %v6391_v57 = vpop.permute.xlu1 %6390  ;;  %8305 = vmatmul.mubr.msk.f32.gmra.mrb[4].mxu1 %vm309_vm1, %v4510_v54  ;;  %v4836_v59 = vpop.permute.xlu0 %4835  ;;  %v8062_v54 = vld [vmem:[%s10230_s3 + $0x248] sm:$0xff] }
 0x35f   : > { %8406 = vmatmul.mubr.msk.f32.vlgmr.msra.gmra.mrb[2].mxu0 %vm309_vm1, %v8030_v55  ;;  %v4840_v61 = vsel %vm4839_vm0, %v4836_v59, %v9631_v25  ;;  %8309 = vmatprep.mubr.msk.f32.mxu1 %vm309_vm1, %v7933_v56  ;;  %v6392_v4 = vsel %vm2652_vm14, %v9719_v52, %v6391_v57  ;;  %v8045_v25 = vld [vmem:[%s10230_s3 + $0x200] sm:$0xff]  ;;  %v8064_v57 = vld [vmem:[%s10230_s3 + $0x258] sm:$0xff]  ;;  %v7967_v59 = vld [vmem:[%s10230_s3 + $0xd0] sm:$0xff] }
 0x360   : > { %8412 = vmatpush3.msra.mxu0 %v6172_v47  ;;  %8315 = vmatprep.subr.mxu1 %v4840_v61  ;;  %v8056_v47 = vld [vmem:[%s10230_s3 + $0x238] sm:$0xff]  ;;  %v7965_v55 = vld [vmem:[%s10230_s3 + $0xc0] sm:$0xff] }
 0x361   : > { %8419 = vmatprep.subr.mxu0 %v6282_v63  ;;  %8408 = vmatprep.mubr.msk.f32.mxu0 %vm309_vm1, %v8031_v60  ;;  %v8069_v60 = vld [vmem:[%s10230_s3 + $0x260] sm:$0xff] }
 0x362   : > { %v9758_v13 = vpop.permute.xlu1 %5399  ;;  %8310 = vmatmul.mubr.msk.f32.vlgmr.msra.gmra.mrb[2].mxu1 %vm309_vm1, %v7934_v62  ;;  %v6501_v14 = vpop.permute.xlu0 %6500  ;;  %v7968_v62 = vld [vmem:[%s10230_s3 + $0xd8] sm:$0xff] }
 0x363   : > { %8316 = vmatpush3.msra.mxu1 %v4840_v61  ;;  %8409 = vmatmul.mubr.msk.f32.gmra.mrb[4].mxu0 %vm309_vm1, %v8032_v6  ;;  %v6502_v24 = vsel %vm5401_vm5, %v9758_v13, %v6501_v14  ;;  %v7973_v6 = vld [vmem:[%s10230_s3 + $0xe0] sm:$0xff] }
 0x364   : > { %8312 = vmatprep.mubr.msk.f32.mxu1 %vm309_vm1, %v7935_v7  ;;  %8413 = vmatprep.mubr.msk.f32.mxu0 %vm309_vm1, %v8037_v9  ;;  %v8071_v7 = vld [vmem:[%s10230_s3 + $0x270] sm:$0xff]  ;;  %v7974_v9 = vld [vmem:[%s10230_s3 + $0xe8] sm:$0xff] }
 0x366   : > { %v4949_v18 = vpop.permute.xlu1 %4948  ;;  %8313 = vmatmul.mubr.msk.f32.gmra.mrb[4].mxu1 %vm309_vm1, %v7936_v15  ;;  %v9774_v1 = vpop.permute.xlu0 %5512  ;;  %v8072_v15 = vld [vmem:[%s10230_s3 + $0x278] sm:$0xff] }
 0x367   : > { %8414 = vmatmul.mubr.msk.f32.vlgmr.msra.gmra.mrb[2].mxu0 %vm309_vm1, %v8038_v16  ;;  %v4953_v8 = vsel %vm4952_vm3, %v4949_v18, %v9646_v42  ;;  %8317 = vmatprep.mubr.msk.f32.mxu1 %vm309_vm1, %v7941_v17  ;;  %v7949_v42 = vld [vmem:[%s10230_s3 + $0x80] sm:$0xff]  ;;  %v7975_v16 = vld [vmem:[%s10230_s3 + $0xf0] sm:$0xff]  ;;  %v7976_v17 = vld [vmem:[%s10230_s3 + $0xf8] sm:$0xff] }
 0x368   : > { %8420 = vmatpush3.msra.mxu0 %v6282_v63  ;;  %8323 = vmatprep.subr.mxu1 %v4953_v8  ;;  %v8070_v63 = vld [vmem:[%s10230_s3 + $0x268] sm:$0xff] }
 0x369   : > { %8427 = vmatprep.subr.mxu0 %v6392_v4  ;;  %8416 = vmatprep.mubr.msk.f32.mxu0 %vm309_vm1, %v8039_v3  ;;  %v8078_v18 = vld [vmem:[%s10230_s3 + $0x288] sm:$0xff]  ;;  %v7981_v3 = vld [vmem:[%s10230_s3 + $0x100] sm:$0xff] }
 0x36a   : > { %v6611_v22 = vpop.permute.xlu1 %6610  ;;  %8318 = vmatmul.mubr.msk.f32.vlgmr.msra.gmra.mrb[2].mxu1 %vm309_vm1, %v7942_v2  ;;  %v5062_v19 = vpop.permute.xlu0 %5061 }
 0x36b   : > { %8324 = vmatpush3.msra.mxu1 %v4953_v8  ;;  %8417 = vmatmul.mubr.msk.f32.gmra.mrb[4].mxu0 %vm309_vm1, %v8040_v10  ;;  %v5065_v28 = vsel %vm1972_vm10, %v5062_v19, %v9678_v35  ;;  %v7952_v35 = vld [vmem:[%s10230_s3 + $0x98] sm:$0xff]  ;;  %v6612_v45 = vsel %vm5514_vm6, %v9774_v1, %v6611_v22  ;;  %v7982_v8 = vld [vmem:[%s10230_s3 + $0x108] sm:$0xff]  ;;  %v7983_v10 = vld [vmem:[%s10230_s3 + $0x110] sm:$0xff] }
 0x36c   : > { %8331 = vmatprep.subr.mxu1 %v5065_v28  ;;  %8320 = vmatprep.mubr.msk.f32.mxu1 %vm309_vm1, %v7943_v12  ;;  %v8085_v12 = vld [vmem:[%s10230_s3 + $0x2a0] sm:$0xff]  ;;  %v8086_v22 = vld [vmem:[%s10230_s3 + $0x2a8] sm:$0xff] }
 0x36d   : > { %8421 = vmatprep.mubr.msk.f32.mxu0 %vm309_vm1, %v8045_v25  ;;  %v7989_v19 = vld [vmem:[%s10230_s3 + $0x120] sm:$0xff]  ;;  %v8087_v25 = vld [vmem:[%s10230_s3 + $0x2b0] sm:$0xff] }
 0x36e   : > { %8321 = vmatmul.mubr.msk.f32.gmra.mrb[4].mxu1 %vm309_vm1, %v7944_v30  ;;  %v9817_v46 = vpop.permute.xlu0 %6827  ;;  %v5174_v21 = vpop.permute.xlu1 %5173  ;;  %v8088_v30 = vld [vmem:[%s10230_s3 + $0x2b8] sm:$0xff] }
 0x36f   : > { %8422 = vmatmul.mubr.msk.f32.vlgmr.msra.gmra.mrb[2].mxu0 %vm309_vm1, %v8046_v32  ;;  %8325 = vmatprep.mubr.msk.f32.mxu1 %vm309_vm1, %v7949_v42  ;;  %v5177_v34 = vsel %vm2312_vm12, %v5174_v21, %v9698_v43  ;;  %v6829_v14 = vsel %vm612_vm2, %v9616_v11, %v9817_v46  ;;  %v7991_v32 = vld [vmem:[%s10230_s3 + $0x130] sm:$0xff]  ;;  %v8093_v42 = vld [vmem:[%s10230_s3 + $0x2c0] sm:$0xff]  ;;  %v8094_v46 = vld [vmem:[%s10230_s3 + $0x2c8] sm:$0xff] }
 0x370   : > { %8428 = vmatpush3.msra.mxu0 %v6392_v4  ;;  %8424 = vmatprep.mubr.msk.f32.mxu0 %vm309_vm1, %v8047_v44  ;;  %v8080_v4 = vld [vmem:[%s10230_s3 + $0x298] sm:$0xff] }
 0x371   : > { %8435 = vmatprep.subr.mxu0 %v6502_v24  ;;  %v7992_v44 = vld [vmem:[%s10230_s3 + $0x138] sm:$0xff] }
 0x372   : > { %8326 = vmatmul.mubr.msk.f32.vlgmr.msra.gmra.mrb[2].mxu1 %vm309_vm1, %v7950_v40  ;;  %v9834_v29 = vpop.permute.xlu0 %6937  ;;  %v5286_v5 = vpop.permute.xlu1 %5285  ;;  %v8095_v40 = vld [vmem:[%s10230_s3 + $0x2d0] sm:$0xff]  ;;  %v8096_v21 = vld [vmem:[%s10230_s3 + $0x2d8] sm:$0xff] }
 0x373   : > { %8332 = vmatpush3.msra.mxu1 %v5065_v28  ;;  %8425 = vmatmul.mubr.msk.f32.gmra.mrb[4].mxu0 %vm309_vm1, %v8048_v26  ;;  %v5289_v50 = vsel %vm2652_vm14, %v5286_v5, %v9719_v52  ;;  %v8063_v52 = vld [vmem:[%s10230_s3 + $0x250] sm:$0xff]  ;;  %v6939_v2 = vsel %vm952_vm4, %v9628_v23, %v9834_v29  ;;  %v7984_v23 = vld [vmem:[%s10230_s3 + $0x118] sm:$0xff]  ;;  %v7990_v28 = vld [vmem:[%s10230_s3 + $0x128] sm:$0xff] }
 0x374   : > { %8339 = vmatprep.subr.mxu1 %v5177_v34  ;;  %8328 = vmatprep.mubr.msk.f32.mxu1 %vm309_vm1, %v7951_v27  ;;  %v8102_v26 = vld [vmem:[%s10230_s3 + $0x2e8] sm:$0xff]  ;;  %v8103_v27 = vld [vmem:[%s10230_s3 + $0x2f0] sm:$0xff]  ;;  %v8104_v29 = vld [vmem:[%s10230_s3 + $0x2f8] sm:$0xff] }
 0x375   : > { %8429 = vmatprep.mubr.msk.f32.mxu0 %vm309_vm1, %v8053_v31  ;;  %v8109_v31 = vld [vmem:[%s10230_s3 + $0x300] sm:$0xff] }
 0x376   : > { %8329 = vmatmul.mubr.msk.f32.gmra.mrb[4].mxu1 %vm309_vm1, %v7952_v35  ;;  %v7048_v39 = vpop.permute.xlu0 %7047  ;;  %v5398_v56 = vpop.permute.xlu1 %5397  ;;  %v8111_v35 = vld [vmem:[%s10230_s3 + $0x310] sm:$0xff] }
 0x377   : > { %8430 = vmatmul.mubr.msk.f32.vlgmr.msra.gmra.mrb[2].mxu0 %vm309_vm1, %v8054_v36  ;;  %8333 = vmatprep.mubr.msk.f32.mxu1 %vm309_vm1, %v7957_v37  ;;  %v9864_v43 = vsel %vm4839_vm0, %v9643_v33, %v7048_v39  ;;  %v5402_v61 = vsel %vm5401_vm5, %v5398_v56, %v9758_v13  ;;  %v8112_v36 = vld [vmem:[%s10230_s3 + $0x318] sm:$0xff] }
 0x378   : > { %8436 = vmatpush3.msra.mxu0 %v6502_v24  ;;  %8432 = vmatprep.mubr.msk.f32.mxu0 %vm309_vm1, %v8055_v38  ;;  %v8101_v24 = vld [vmem:[%s10230_s3 + $0x2e0] sm:$0xff] }
 0x379   : > { %8443 = vmatprep.subr.mxu0 %v6612_v45 }
 0x37a   : > { %8334 = vmatmul.mubr.msk.f32.vlgmr.msra.gmra.mrb[2].mxu1 %vm309_vm1, %v7958_v41  ;;  %v7158_v33 = vpop.permute.xlu0 %7157  ;;  %v5511_v13 = vpop.permute.xlu1 %5510 }
 0x37b   : > { %8340 = vmatpush3.msra.mxu1 %v5177_v34  ;;  %8433 = vmatmul.mubr.msk.f32.gmra.mrb[4].mxu0 %vm309_vm1, %v8056_v47  ;;  %v9887_v53 = vsel %vm4952_vm3, %v9658_v20, %v7158_v33  ;;  %v7966_v20 = vld [vmem:[%s10230_s3 + $0xc8] sm:$0xff]  ;;  %v5515_v11 = vsel %vm5514_vm6, %v5511_v13, %v9774_v1  ;;  %v8079_v1 = vld [vmem:[%s10230_s3 + $0x290] sm:$0xff]  ;;  %v8120_v13 = vld [vmem:[%s10232_s5 + $0x38] sm:$0xff] }
 0x37c   : > { %8347 = vmatprep.subr.mxu1 %v5289_v50  ;;  %8336 = vmatprep.mubr.msk.f32.mxu1 %vm309_vm1, %v7959_v48  ;;  %v8110_v34 = vld [vmem:[%s10230_s3 + $0x308] sm:$0xff] }
 0x37d   : > { %8437 = vmatprep.mubr.msk.f32.mxu0 %vm309_vm1, %v8061_v49 }
 0x37e   : > { %8337 = vmatmul.mubr.msk.f32.gmra.mrb[4].mxu1 %vm309_vm1, %v7960_v51 }
 0x37f   : > { %8438 = vmatmul.mubr.msk.f32.vlgmr.msra.gmra.mrb[2].mxu0 %vm309_vm1, %v8062_v54  ;;  %8341 = vmatprep.mubr.msk.f32.mxu1 %vm309_vm1, %v7965_v55 }
 0x380   : > { %8444 = vmatpush3.msra.mxu0 %v6612_v45  ;;  %8440 = vmatprep.mubr.msk.f32.mxu0 %vm309_vm1, %v8063_v52 }
 0x381   : > { %8451 = vmatprep.subr.mxu0 %v9540_v58 }
 0x382   : > { %8342 = vmatmul.mubr.msk.f32.vlgmr.msra.gmra.mrb[2].mxu1 %vm309_vm1, %v7966_v20 }
 0x383   : > { %8348 = vmatpush3.msra.mxu1 %v5289_v50  ;;  %8441 = vmatmul.mubr.msk.f32.gmra.mrb[4].mxu0 %vm309_vm1, %v8064_v57 }
 0x384   : > { %8355 = vmatprep.subr.mxu1 %v5402_v61  ;;  %8344 = vmatprep.mubr.msk.f32.mxu1 %vm309_vm1, %v7967_v59 }
 0x385   : > { %8445 = vmatprep.mubr.msk.f32.mxu0 %vm309_vm1, %v8069_v60 }
 0x386   : > { %8345 = vmatmul.mubr.msk.f32.gmra.mrb[4].mxu1 %vm309_vm1, %v7968_v62 }
 0x387   : > { %8446 = vmatmul.mubr.msk.f32.vlgmr.msra.gmra.mrb[2].mxu0 %vm309_vm1, %v8070_v63  ;;  %8349 = vmatprep.mubr.msk.f32.mxu1 %vm309_vm1, %v7973_v6  ;;  %v8117_v63 = vld [vmem:[%s10232_s5 + $0x20] sm:$0xff]  ;;  %v8118_v6 = vld [vmem:[%s10232_s5 + $0x28] sm:$0xff] }
 0x388   : > { %8452 = vmatpush3.msra.mxu0 %v9540_v58  ;;  %8448 = vmatprep.mubr.msk.f32.mxu0 %vm309_vm1, %v8071_v7  ;;  %v8077_v58 = vld [vmem:[%s10230_s3 + $0x280] sm:$0xff]  ;;  %v8119_v7 = vld [vmem:[%s10232_s5 + $0x30] sm:$0xff] }
 0x389   : > { %8459 = vmatprep.subr.mxu0 %v6829_v14 }
 0x38a   : > { %8350 = vmatmul.mubr.msk.f32.vlgmr.msra.gmra.mrb[2].mxu1 %vm309_vm1, %v7974_v9  ;;  %v8547_v9 = vpack.c.bf16 %v8118_v6, %v8117_v63 }
 0x38b   : > { %8356 = vmatpush3.msra.mxu1 %v5402_v61  ;;  %8449 = vmatmul.mubr.msk.f32.gmra.mrb[4].mxu0 %vm309_vm1, %v8072_v15  ;;  %v7274_v45 = vpop.permute.xlu0 %7273  ;;  %v8550_v15 = vpack.c.bf16 %v8120_v13, %v8119_v7 }
 0x38c   : > { %8363 = vmatprep.subr.mxu1 %v5515_v11  ;;  %8352 = vmatprep.mubr.msk.f32.mxu1 %vm309_vm1, %v7975_v16 }
 0x38d   : > { %8453 = vmatprep.mubr.msk.f32.mxu0 %vm309_vm1, %v8077_v58 }
 0x38e   : > { %8353 = vmatmul.mubr.msk.f32.gmra.mrb[4].mxu1 %vm309_vm1, %v7976_v17 }
 0x38f   : > { %8454 = vmatmul.mubr.msk.f32.vlgmr.msra.gmra.mrb[2].mxu0 %vm309_vm1, %v8078_v18  ;;  %8357 = vmatprep.mubr.msk.f32.mxu1 %vm309_vm1, %v7981_v3 }
 0x390   : > { %8460 = vmatpush3.msra.mxu0 %v6829_v14  ;;  %8456 = vmatprep.mubr.msk.f32.mxu0 %vm309_vm1, %v8079_v1  ;;  %v8926_v14 = vmov 0.0|0.0  }
 0x391   : > { %8467 = vmatprep.subr.mxu0 %v6939_v2 }
 0x392   : > { %8358 = vmatmul.mubr.msk.f32.vlgmr.msra.gmra.mrb[2].mxu1 %vm309_vm1, %v7982_v8 }
 0x393   : > { %8364 = vmatpush3.msra.mxu1 %v5515_v11  ;;  %8457 = vmatmul.mubr.msk.f32.gmra.mrb[4].mxu0 %vm309_vm1, %v8080_v4 }
 0x394   : > { %8360 = vmatprep.mubr.msk.f32.mxu1 %vm309_vm1, %v7983_v10  ;;  %8461 = vmatprep.mubr.msk.f32.mxu0 %vm309_vm1, %v8085_v12 }
 0x395   : > { %8546 = vmatprep.subr.bf16.mxu1 %v8926_v14 }
 0x396   : > { %8361 = vmatmul.mubr.msk.f32.gmra.mrb[4].mxu1 %vm309_vm1, %v7984_v23 }
 0x397   : > { %8462 = vmatmul.mubr.msk.f32.vlgmr.msra.gmra.mrb[2].mxu0 %vm309_vm1, %v8086_v22  ;;  %8365 = vmatprep.mubr.msk.f32.mxu1 %vm309_vm1, %v7989_v19 }
 0x398   : > { %8468 = vmatpush3.msra.mxu0 %v6939_v2  ;;  %8464 = vmatprep.mubr.msk.f32.mxu0 %vm309_vm1, %v8087_v25 }
 0x399   : > { %8475 = vmatprep.subr.mxu0 %v9864_v43 }
 0x39a   : > { %8366 = vmatmul.mubr.msk.f32.vlgmr.msra.gmra.mrb[2].mxu1 %vm309_vm1, %v7990_v28 }
 0x39b   : > { %8465 = vmatmul.mubr.msk.f32.gmra.mrb[4].mxu0 %vm309_vm1, %v8088_v30  ;;  %8368 = vmatprep.mubr.msk.f32.mxu1 %vm309_vm1, %v7991_v32 }
 0x39c   : > { %8469 = vmatprep.mubr.msk.f32.mxu0 %vm309_vm1, %v8093_v42  ;;  %8548 = vmatpush3.bf16.msra.mxu1 %v8547_v9 }
 0x39d   : > { %8549 = vmatprep.subr.bf16.mxu1 %v8926_v14 }
 0x39e   : > { %8369 = vmatmul.mubr.msk.f32.gmra.mrb[4].mxu1 %vm309_vm1, %v7992_v44 }
 0x39f   : > { %8470 = vmatmul.mubr.msk.f32.vlgmr.msra.gmra.mrb[2].mxu0 %vm309_vm1, %v8094_v46 }
 0x3a0   : > { %8476 = vmatpush3.msra.mxu0 %v9864_v43  ;;  %8472 = vmatprep.mubr.msk.f32.mxu0 %vm309_vm1, %v8095_v40  ;;  %v7269_v43 = vpop.permute.xlu1 %7268 }
 0x3a1   : > { %8483 = vmatprep.subr.mxu0 %v9887_v53  ;;  %8551 = vmatpush3.bf16.msra.mxu1 %v8550_v15 }
 0x3a2   : > { %8552 = vmatprep.subr.bf16.mxu1 %v8926_v14 }
 0x3a3   : > { %8473 = vmatmul.mubr.msk.f32.gmra.mrb[4].mxu0 %vm309_vm1, %v8096_v21 }
 0x3a4   : > { %8477 = vmatprep.mubr.msk.f32.mxu0 %vm309_vm1, %v8101_v24  ;;  %v7279_v33 = vpop.permute.xlu1 %7278  ;;  %v7378_v24 = vld [vmem:[%s10232_s5] sm:$0xff] }
 0x3a7   : > { %8478 = vmatmul.mubr.msk.f32.vlgmr.msra.gmra.mrb[2].mxu0 %vm309_vm1, %v8102_v26  ;;  %v7379_v26 = vld [vmem:[%s10232_s5 + $0x8] sm:$0xff] }
 0x3a8   : > { %8484 = vmatpush3.msra.mxu0 %v9887_v53  ;;  %8480 = vmatprep.mubr.msk.f32.mxu0 %vm309_vm1, %v8103_v27  ;;  %v7284_v56 = vpop.permute.xlu1 %7283 }
 0x3ab   : > { %8481 = vmatmul.mubr.msk.f32.gmra.mrb[4].mxu0 %vm309_vm1, %v8104_v29  ;;  %v8553_v29 = vpack.c.bf16 %v7379_v26, %v7378_v24 }
 0x3ac   : > { %8485 = vmatprep.mubr.msk.f32.mxu0 %vm309_vm1, %v8109_v31 }
 0x3af   : > { %8486 = vmatmul.mubr.msk.f32.vlgmr.msra.gmra.mrb[2].mxu0 %vm309_vm1, %v8110_v34  ;;  %v7380_v34 = vld [vmem:[%s10232_s5 + $0x10] sm:$0xff] }
 0x3b0   : > { %8488 = vmatprep.mubr.msk.f32.mxu0 %vm309_vm1, %v8111_v35  ;;  %v7381_v35 = vld [vmem:[%s10232_s5 + $0x18] sm:$0xff] }
 0x3b3   : > { %8489 = vmatmul.mubr.msk.f32.gmra.mrb[4].mxu0 %vm309_vm1, %v8112_v36  ;;  %vm8927_vm1 = vmmov 0   ;;  %v8556_v36 = vpack.c.bf16 %v7381_v35, %v7380_v34 }
 0x3b4   : > { %8499 = vmatprep.mubr.msk.f32.mxu1 %vm8927_vm1, %v8901_v0 }
 0x46d   : > { %v8367_v37 = vpop.f32.mrb[2].mxu1 }
 0x46e   : > { %v5595_v38 = vpop.f32.mrb[3].mxu1 }
 0x471   : > { %v8370_v39 = vpop.f32.mrb[4].mxu1 }
 0x472   : > { %v5605_v41 = vpop.f32.mrb[5].mxu1 }
 0x482   : > { %v8487_v5 = vpop.f32.mrb[2].mxu0 }
 0x483   : > { %v8576_v47 = vadd.f32 %v8487_v5, %v8367_v37  ;;  %v7239_v48 = vpop.f32.mrb[3].mxu0  ;;  %v8123_v37 = vld [vmem:[%s10232_s5 + $0x40] sm:$0xff] }
 0x484   : > { %v8577_v49 = vadd.f32 %v7239_v48, %v5595_v38  ;;  %v8124_v38 = vld [vmem:[%s10232_s5 + $0x48] sm:$0xff] }
 0x485   : > { %v7287_v50 = vadd.f32 %v8576_v47, %v7274_v45  ;;  %v8128_v45 = vld [vmem:[%s10232_s5 + $0x60] sm:$0xff]  ;;  %v8129_v47 = vld [vmem:[%s10232_s5 + $0x68] sm:$0xff] }
 0x486   : > { %v8490_v51 = vpop.f32.mrb[4].mxu0  ;;  %v7286_v53 = vadd.f32 %v8577_v49, %v7269_v43  ;;  %v8126_v43 = vld [vmem:[%s10232_s5 + $0x58] sm:$0xff]  ;;  %v8130_v49 = vld [vmem:[%s10232_s5 + $0x70] sm:$0xff] }
 0x487   : > { %v7291_v54 = vmax.f32 %v7287_v50, 0.0  ;;  %v8578_v55 = vadd.f32 %v8490_v51, %v8370_v39  ;;  %v7249_v52 = vpop.f32.mrb[5].mxu0  ;;  %v8559_v39 = vpack.c.bf16 %v8124_v38, %v8123_v37  ;;  %v8131_v50 = vld [vmem:[%s10232_s5 + $0x78] sm:$0xff] }
 0x488   : > { %v8579_v20 = vadd.f32 %v7249_v52, %v5605_v41  ;;  %v7290_v57 = vmax.f32 %v7286_v53, 0.0  ;;  %v8125_v41 = vld [vmem:[%s10232_s5 + $0x50] sm:$0xff]  ;;  %v8568_v51 = vpack.c.bf16 %v8131_v50, %v8130_v49  ;;  %v8133_v53 = vld [vmem:[%s10232_s5 + $0x80] sm:$0xff] }
 0x489   : > { %7316 = vrot.lane.b32.xlu0 %v7291_v54, %s8911_s13  ;;  %7300 = vrot.lane.b32.xlu1 %v7291_v54, %s8903_s19  ;;  %v7289_v59 = vadd.f32 %v8578_v55, %v7284_v56  ;;  %v8562_v5 = vpack.c.bf16 %v8126_v43, %v8125_v41  ;;  %v8136_v56 = vld [vmem:[%s10232_s5 + $0x98] sm:$0xff] }
 0x48a   : > { %v7288_v61 = vadd.f32 %v8579_v20, %v7279_v33  ;;  %v8565_v33 = vpack.c.bf16 %v8129_v47, %v8128_v45  ;;  %v8135_v20 = vld [vmem:[%s10232_s5 + $0x90] sm:$0xff] }
 0x48b   : > { %v7293_v60 = vmax.f32 %v7289_v59, 0.0 }
 0x48c   : > { %v7292_v62 = vmax.f32 %v7288_v61, 0.0 }
 0x48d   : > { %7332 = vrot.lane.b32.xlu0 %v7291_v54, %s8913_s15  ;;  %7330 = vrot.lane.b32.xlu1 %v7290_v57, %s8913_s15 }
 0x491   : > { %7298 = vrot.lane.b32.xlu0 %v7290_v57, %s8903_s19  ;;  %7320 = vrot.lane.b32.xlu1 %v7293_v60, %s8911_s13 }
 0x495   : > { %7314 = vrot.lane.b32.xlu0 %v7290_v57, %s8911_s13  ;;  %7302 = vrot.lane.b32.xlu1 %v7292_v62, %s8903_s19 }
 0x499   : > { %7304 = vrot.lane.b32.xlu0 %v7293_v60, %s8903_s19  ;;  %7318 = vrot.lane.b32.xlu1 %v7292_v62, %s8911_s13  ;;  %s8837_s19 = scalar_lea.vmem %s10187_s14, 16  ;;  %s8841_s13 = sshll.u32 %s8928_s28, 4  ;;  %s8842_s13 = int_to_ptr.vmem [resolvable:$false] %s8841_s13 }
 0x49a   : > { %p8838_p11 = scmp.ne.s32.totalorder %s10187_s14, %s8837_s19  ;;  %p8844_p0 = scmp.lt.s32.totalorder %s10187_s14, %s8842_s13 }
 0x49c   : > { %p8839_p12 = pnand %p8838_p11, %p9007_p5 }
 0x49d   : > { %7334 = vrot.lane.b32.xlu0 %v7292_v62, %s8913_s15  ;;  %7336 = vrot.lane.b32.xlu1 %v7293_v60, %s8913_s15  ;;  %s8843_s15 = scalar_lea.vmem %s8842_s13, 32 }
 0x49e   : > { %p8840_p13 = pneg %p8839_p12  ;;  %p8845_p1 = scmp.lt.s32.totalorder %s8843_s15, %s8837_s19 }
 0x4a0   : > { %p8846_p2 = por %p8845_p1, %p8844_p0 }
 0x4a2   : > { %p8847_p3 = pnand %p8846_p2, %p8840_p13 }
 0x4fb   : > { %v7317_v16 = vpop.permute.xlu0 %7316  ;;  %v7301_v58 = vpop.permute.xlu1 %7300 }
 0x4fc   : > { %v7311_v1 = vmax.f32 %v7291_v54, %v7301_v58  ;;  %v8134_v54 = vld [vmem:[%s10232_s5 + $0x88] sm:$0xff] }
 0x4fd   : > { %v8571_v55 = vpack.c.bf16 %v8134_v54, %v8133_v53 }
 0x4fe   : > { %v7327_v12 = vmax.f32 %v7311_v1, %v7317_v16 }
 0x4ff   : > { %v7333_v11 = vpop.permute.xlu0 %7332  ;;  %v7331_v17 = vpop.permute.xlu1 %7330 }
 0x500   : > { %v7343_v25 = vmax.f32 %v7327_v12, %v7333_v11 }
 0x503   : > { %v7299_v18 = vpop.permute.xlu0 %7298  ;;  %v7321_v3 = vpop.permute.xlu1 %7320 }
 0x504   : > { %v7310_v8 = vmax.f32 %v7290_v57, %v7299_v18  ;;  %v8574_v57 = vpack.c.bf16 %v8136_v56, %v8135_v20 }
 0x507   : > { %v7315_v2 = vpop.permute.xlu0 %7314  ;;  %v7303_v4 = vpop.permute.xlu1 %7302 }
 0x508   : > { %v7326_v10 = vmax.f32 %v7310_v8, %v7315_v2  ;;  %v7312_v28 = vmax.f32 %v7292_v62, %v7303_v4 }
 0x50a   : > { %v7342_v23 = vmax.f32 %v7326_v10, %v7331_v17 }
 0x50b   : > { %v7305_v22 = vpop.permute.xlu0 %7304  ;;  %v7319_v19 = vpop.permute.xlu1 %7318 }
 0x50c   : > { %7346 = vxpose.xlu0.b32.start [1/4] (short) (narrow) %v7342_v23, 24  ;;  %v7313_v30 = vmax.f32 %v7293_v60, %v7305_v22  ;;  %v7328_v42 = vmax.f32 %v7312_v28, %v7319_v19 }
 0x50e   : > { %v7329_v46 = vmax.f32 %v7313_v30, %v7321_v3 }
 0x50f   : > { %v7335_v32 = vpop.permute.xlu0 %7334  ;;  %v7337_v40 = vpop.permute.xlu1 %7336 }
 0x510   : > { %7347 = vxpose.xlu0.b32.cont [2/4] (short) (narrow) %v7343_v25, 24  ;;  %v7344_v44 = vmax.f32 %v7328_v42, %v7335_v32  ;;  %v7345_v21 = vmax.f32 %v7329_v46, %v7337_v40 }
 0x514   : > { %7348 = vxpose.xlu0.b32.cont [3/4] (short) (narrow) %v7344_v44, 24 }
 0x518   : > { %7349 = vxpose.xlu0.b32.end [4/4] (short) (narrow) %v7345_v21, 24 }
 0x58c   : > { %v7362_v27 = vpop.trf.xlu0 }
 0x58d   : > { %v7388_v31 = vrot.slane %v7362_v27, 4 }
 0x58f   : > { %8500 = vmatmul.mubr.msk.f32.vlgmr.msra.gmra.mrb[6].mxu1 %vm2822_vm15, %v7388_v31 }
 0x590   : > { %8554 = vmatpush3.bf16.msra.mxu1 %v8553_v29  ;;  %8510 = vmatprep.mubr.msk.f32.mxu1 %vm8927_vm1, %v8901_v0  ;;  %v7363_v48 = vpop.trf.xlu0 }
 0x591   : > { %8555 = vmatprep.subr.bf16.mxu1 %v8926_v14  ;;  %v7617_v52 = vrot.slane %v7363_v48, 4 }
 0x594   : > { %8557 = vmatpush3.bf16.msra.mxu1 %v8556_v36  ;;  %v7364_v59 = vpop.trf.xlu0 }
 0x595   : > { %8558 = vmatprep.subr.bf16.mxu1 %v8926_v14 }
 0x597   : > { %8511 = vmatmul.mubr.msk.f32.vlgmr.msra.gmra.mrb[8].mxu1 %vm2822_vm15, %v7362_v27 }
 0x598   : > { %8560 = vmatpush3.bf16.msra.mxu1 %v8559_v39  ;;  %8521 = vmatprep.mubr.msk.f32.mxu1 %vm8927_vm1, %v8901_v0 }
 0x599   : > { %8561 = vmatprep.subr.bf16.mxu1 %v8926_v14 }
 0x59c   : > { %8563 = vmatpush3.bf16.msra.mxu1 %v8562_v5 }
 0x59d   : > { %8564 = vmatprep.subr.bf16.mxu1 %v8926_v14 }
 0x59f   : > { %8522 = vmatmul.mubr.msk.f32.vlgmr.msra.gmra.mrb[10].mxu1 %vm2822_vm15, %v7363_v48 }
 0x5a0   : > { %8566 = vmatpush3.bf16.msra.mxu1 %v8565_v33  ;;  %8532 = vmatprep.mubr.msk.f32.mxu1 %vm8927_vm1, %v8901_v0 }
 0x5a1   : > { %8567 = vmatprep.subr.bf16.mxu1 %v8926_v14 }
 0x5a4   : > { %8569 = vmatpush3.bf16.msra.mxu1 %v8568_v51 }
 0x5a5   : > { %8570 = vmatprep.subr.bf16.mxu1 %v8926_v14 }
 0x5a7   : > { %8533 = vmatmul.mubr.msk.f32.vlgmr.msra.gmra.mrb[12].mxu1 %vm2822_vm15, %v7617_v52 }
 0x5a8   : > { %8572 = vmatpush3.bf16.msra.mxu1 %v8571_v55  ;;  %8543 = vmatprep.mubr.msk.f32.mxu1 %vm8927_vm1, %v8901_v0 }
 0x5a9   : > { %8573 = vmatprep.subr.bf16.mxu1 %v8926_v14  ;;  %v7770_v14 = vld [vmem:[%s10233_s6] sm:$0x1] }
 0x5ac   : > { %8575 = vmatpush3.bf16.msra.mxu1 %v8574_v57 }
 0x5af   : > { %8544 = vmatmul.mubr.msk.f32.vlgmr.msra.gmra.mrb[14].mxu1 %vm2822_vm15, %v7364_v59 }
 0x662   : > { %v7457_v60 = vpop.f32.mrb[6].mxu1 }
 0x663   : > { %v8501_v61 = vpop.f32.mrb[7].mxu1 }
 0x66a   : > { %v7529_v62 = vpop.f32.mrb[8].mxu1 }
 0x66b   : > { %v7530_v63 = vadd.f32 %v7529_v62, %v7457_v60  ;;  %v8512_v6 = vpop.f32.mrb[9].mxu1 }
 0x672   : > { %v7607_v7 = vpop.f32.mrb[10].mxu1 }
 0x673   : > { %v7611_v9 = vadd.f32 %v7607_v7, %v7530_v63  ;;  %v8523_v13 = vpop.f32.mrb[11].mxu1 }
 0x67a   : > { %v7686_v15 = vpop.f32.mrb[12].mxu1 }
 0x67b   : > { %v7690_v16 = vadd.f32 %v7686_v15, %v7611_v9  ;;  %v8534_v58 = vpop.f32.mrb[13].mxu1 }
 0x682   : > { %v7765_v0 = vpop.f32.mrb[14].mxu1 }
 0x683   : > { %v7769_v11 = vadd.f32 %v7765_v0, %v7690_v16  ;;  %v8545_v17 = vpop.f32.mrb[15].mxu1 }
 0x685   : > { %v7771_v18 = vadd.f32 %v7770_v14, %v7769_v11 }
 0x687   : > { %v7772_v3 = vmax.f32 %v7771_v18, 0.0 }
 0x689   : > { %7773 = vst [vmem:[%s270_s9] sm:$0x1] %v7772_v3 }
 0x68a   : > { %8850 = shalt.err (!%p8847_p3)
}
 0x68b   : > { %s8851_s18 = scalar_lea.hbm %s10185_s16, 16  ;;  %s8855_s20 = scalar_lea.hbm %s10234_s7, 32 }
 0x68c   : > { %p8852_p4 = scmp.ne.s32.totalorder %s10185_s16, %s8851_s18  ;;  %p8856_p9 = scmp.lt.u32.totalorder %s10185_s16, %s10234_s7 }
 0x68d   : > { %p8857_p10 = scmp.lt.u32.totalorder %s8855_s20, %s8851_s18  ;;  %p8859_p12 = scmp.lt.u32.totalorder %s8851_s18, %s10185_s16 }
 0x68e   : > { %p8853_p7 = pnand %p8852_p4, %p9007_p5 }
 0x68f   : > { %p8858_p11 = por %p8857_p10, %p8856_p9 }
 0x690   : > { %p8854_p8 = pneg %p8853_p7 }
 0x691   : > { %p8860_p13 = por %p8859_p12, %p8858_p11 }
 0x693   : > { %p8861_p0 = pnand %p8860_p13, %p8854_p8 }
 0x695   : > { %8864 = shalt.err (!%p8861_p0)
}
 0x696   : > { %8769 = dma.vmem_to_hbm [thread:$0]  (%p9007_p5), %s10187_s14, 16, %s10185_s16, %s7775_s21  }
 0x697 PF: > { %p8775_p1 = scmp.ge.s32.totalorder %s8899_s27, 2  ;;  %s7799_s17 = sand.u32 1, %s8887_s24  }
 0x698   : > { %s7800_s8 = scalar_lea.sflag [#allocation3], %s7799_s17 }
 0x699   : > { %p8772_p2 = pnand %p8775_p1, %p9011_p6 }
 0x69b   : > { %8882 = dma.done.wait (!%p8772_p2), %s7800_s8, 16  }
 0x69c   : > { %8884 = vsyncadd (!%p8772_p2), %s7800_s8, 4294967280  ;;  %p17_p3 = scmp.ge.s32.totalorder %s8994_s30, 4   ;;  %s10237_s24 = smov %s8891_s25 }
 0x69d   : > { %s10238_s25 = smov %s8895_s26  ;;  %s10239_s26 = smov %s9005_s10 }
 0x69e   : > { %s10240_s27 = smov %s8994_s30  ;;  %19 = sbr.rel (!%p17_p3) target bundleno = 3 (0x3), region = 135 }
 0x6a5   :  { %7804 = vsyncpa [#allocation3], 1 }
 0x6a6   :  { %7806 = vsyncpa [#allocation3 + $0x1], 1 }

</bundles_post_ra>
